<compile_context>
chip_gen: v5e
topology: v5e:2x2
jax: 0.10.0
libtpu: 0.0.40
codegen_flags: <defaults>
</compile_context>

<pallas_src>
import functools

import jax
import jax.numpy as jnp
from jax.experimental import pallas as pl
from jax.experimental.pallas import tpu as pltpu


# ----------------------------------------------------------------------------
# Fused encoder kernel: pos-enc (layer==0) + one EncoderLayer per grid step
# ----------------------------------------------------------------------------
def _encoder_kernel(pos_ref, feat_ref, mask_ref,
                    pe_w1_ref, pe_w2_ref, pe_vec_ref,
                    wq_ref, wk_ref, wv_ref, wo_ref,
                    fw1_ref, fw2_ref, lvec_ref, fb1_ref,
                    out_ref, x_vmem, bias_vmem,
                    *, n_head, d_k, d_v, resident_weights):
    bt, n, d_model = feat_ref.shape
    layer = pl.program_id(1)
    n_layers = pl.num_programs(1)

    def layer_norm(y, g, b):                      # stats in f32, eps=1e-6
        mu = jnp.mean(y, axis=-1, keepdims=True)
        var = jnp.mean((y - mu) ** 2, axis=-1, keepdims=True)
        return (y - mu) * jax.lax.rsqrt(var + 1e-6) * g + b

    # ------ stage 0 (once per batch tile): PositionalEncoding + add + LN ----
    @pl.when(layer == 0)
    def _():
        pos = pos_ref[...].reshape(bt * n, 2).astype(jnp.float32)
        feat = feat_ref[...].reshape(bt * n, d_model).astype(jnp.float32)
        pvec = pe_vec_ref[...]                    # (4, D): pe_b1, pe_b2, ln_g, ln_b
        pe_b1, pe_b2 = pvec[0:1, :], pvec[1:2, :]
        ln_g, ln_b = pvec[2:3, :], pvec[3:4, :]
        h = jnp.maximum(
            jnp.dot(pos, pe_w1_ref[...], preferred_element_type=jnp.float32) + pe_b1,
            0.0)
        pe = jnp.dot(h, pe_w2_ref[...], preferred_element_type=jnp.float32) + pe_b2
        # TODO(synk): nn.Dropout(p=0.1) is stochastic in train mode; eval-mode identity here.
        x_vmem[...] = layer_norm(feat + pe, ln_g, ln_b)
        # additive key-mask bias, computed once and reused by every layer
        bias_vmem[...] = jnp.where(mask_ref[...] > 0, 0.0, -1e9).astype(jnp.float32)

    # ------ one EncoderLayer ------------------------------------------------
    li = layer if resident_weights else 0         # static 0 when streaming per layer

    x = x_vmem[...]                               # (bt*n, D) f32, VMEM-resident
    lvec = lvec_ref[li]                           # (5, D) packed per-layer vectors
    ln1_g, ln1_b = lvec[0:1, :], lvec[1:2, :]
    fb2 = lvec[2:3, :]
    ln2_g, ln2_b = lvec[3:4, :], lvec[4:5, :]
    fb1 = fb1_ref[li]                             # (1, d_inner)

    wq, wk, wv, wo = wq_ref[li], wk_ref[li], wv_ref[li], wo_ref[li]   # bf16 weights
    x_bf = x.astype(jnp.bfloat16)

    # flattened dense projections over all bt*n rows; cast to bf16 once
    # (scale 1/sqrt(d_k) already folded into wq at packing time)
    q = jnp.dot(x_bf, wq, preferred_element_type=jnp.float32).astype(jnp.bfloat16)
    k = jnp.dot(x_bf, wk, preferred_element_type=jnp.float32).astype(jnp.bfloat16)
    v = jnp.dot(x_bf, wv, preferred_element_type=jnp.float32).astype(jnp.bfloat16)

    # batch heads into a single pair of batched einsums (no per-b loop / concat)
    qh = q.reshape(bt, n, n_head, d_k).transpose(0, 2, 1, 3).reshape(bt * n_head, n, d_k)
    kh = k.reshape(bt, n, n_head, d_k).transpose(0, 2, 1, 3).reshape(bt * n_head, n, d_k)
    vh = v.reshape(bt, n, n_head, d_v).transpose(0, 2, 1, 3).reshape(bt * n_head, n, d_v)

    key_bias = jnp.broadcast_to(bias_vmem[...][:, None, :, :],
                                (bt, n_head, 1, n)).reshape(bt * n_head, 1, n)

    s = jnp.einsum("Bqd,Bkd->Bqk", qh, kh,
                   preferred_element_type=jnp.float32)                # (bt*H,n,n) f32
    s = s + key_bias
    s = s - jnp.max(s, axis=-1, keepdims=True)
    e = jnp.exp(s)
    p = e * pl.reciprocal(jnp.sum(e, axis=-1, keepdims=True), approx=True)
    o = jnp.einsum("Bqk,Bkd->Bqd", p.astype(jnp.bfloat16), vh,
                   preferred_element_type=jnp.float32)                # (bt*H,n,dv)
    concat = o.reshape(bt, n_head, n, d_v).transpose(0, 2, 1, 3) \
              .reshape(bt * n, n_head * d_v)                          # concat heads

    # single concat-of-heads output projection
    attn = jnp.dot(concat.astype(jnp.bfloat16), wo,
                   preferred_element_type=jnp.float32)                # (bt*n, D)
    y = layer_norm(attn + x, ln1_g, ln1_b)

    # PositionwiseFeedForward (ReLU fused with the bf16 cast)
    # TODO(synk): for very large d_inner on v7x (64 MiB VMEM) chunk this over d_inner.
    h1 = jnp.maximum(
        jnp.dot(y.astype(jnp.bfloat16), fw1_ref[li],
                preferred_element_type=jnp.float32) + fb1, 0.0).astype(jnp.bfloat16)
    f = jnp.dot(h1, fw2_ref[li], preferred_element_type=jnp.float32) + fb2
    z = layer_norm(f + y, ln2_g, ln2_b)

    x_vmem[...] = z                               # carry to next layer (stays in VMEM)

    @pl.when(layer == n_layers - 1)
    def _():
        out_ref[...] = z.reshape(bt, n, d_model).astype(out_ref.dtype)


# ----------------------------------------------------------------------------
# One-time weight packing (hoisted out of the per-call forward path)
# ----------------------------------------------------------------------------
def pack_encoder_params(params, *, n_head, d_k, d_v):
    del n_head, d_v
    lyr = params["layers"]
    scale = 1.0 / (d_k ** 0.5)
    return {
        "pe_w1": params["pe_w1"].astype(jnp.float32),
        "pe_w2": params["pe_w2"].astype(jnp.float32),
        "pe_vec": jnp.stack([params["pe_b1"], params["pe_b2"],
                             params["ln_g"], params["ln_b"]]).astype(jnp.float32),
        "wq": jnp.stack([lp["wq"] * scale for lp in lyr]).astype(jnp.bfloat16),
        "wk": jnp.stack([lp["wk"] for lp in lyr]).astype(jnp.bfloat16),
        "wv": jnp.stack([lp["wv"] for lp in lyr]).astype(jnp.bfloat16),
        "wo": jnp.stack([lp["wo"] for lp in lyr]).astype(jnp.bfloat16),
        "fw1": jnp.stack([lp["fw1"] for lp in lyr]).astype(jnp.bfloat16),
        "fw2": jnp.stack([lp["fw2"] for lp in lyr]).astype(jnp.bfloat16),
        "lvec": jnp.stack([jnp.stack([lp["ln1_g"], lp["ln1_b"], lp["fb2"],
                                      lp["ln2_g"], lp["ln2_b"]])
                           for lp in lyr]).astype(jnp.float32),        # (L,5,D)
        "fb1": jnp.stack([lp["fb1"] for lp in lyr])[:, None, :].astype(jnp.float32),
    }


def _pick_batch_tile(B, max_tile=8):
    """Largest divisor of B <= max_tile, but keep >= 2 grid steps when B > 1 so
    the 'parallel' batch axis can shard across both v7x TensorCores."""
    bt = min(B, max_tile)
    while B % bt:
        bt -= 1
    while bt > 1 and B // bt < 2:
        bt -= 1
        while B % bt:
            bt -= 1
    return bt


# ----------------------------------------------------------------------------
# Wrapper
# ----------------------------------------------------------------------------
def encoder_forward(src_seq, src_mask, packed, *, n_head, d_k, d_v):
    B, N, _ = src_seq.shape
    L, D, HK = packed["wq"].shape
    HV = n_head * d_v
    d_inner = packed["fw1"].shape[2]
    bt = _pick_batch_tile(B)

    pos = src_seq[:, :, :2]
    feat = src_seq[:, :, 2:]

    # ---- VMEM budget & weight-residency decision ---------------------------
    per_layer_w = (D * HK * 2 + D * HV + HV * D + 2 * D * d_inner) * 2   # bf16 bytes
    per_layer_v = (5 * D + d_inner) * 4
    stack_bytes = L * (per_layer_w + per_layer_v)
    # resident when the double-buffered full stack is comfortably small (safe on
    # v5e/v6e 128 MiB and on v7x 64 MiB for small models); otherwise stream per layer.
    resident = (2 * stack_bytes) <= (24 << 20)
    weight_buf = 2 * (stack_bytes if resident else (per_layer_w + per_layer_v))
    act_in = 2 * bt * N * (2 + D + 1) * 4                 # double-buffered inputs
    out_buf = 2 * bt * N * D * 4
    scratch = bt * N * D * 4 + bt * N * 4
    inter = (3 * bt * N * max(HK, HV) * 2                 # q/k/v bf16
             + 2 * bt * n_head * N * N * 4                # scores / probs f32
             + bt * N * d_inner * 6                       # FFN hidden f32 + bf16
             + 6 * bt * N * D * 4)                        # residual/LN temporaries
    est = act_in + out_buf + weight_buf + scratch + inter + (2 * D + D * D + 4 * D) * 4
    vmem_limit = int(min(max(1.25 * est + (4 << 20), 32 << 20), 96 << 20))

    def w_spec(tail):
        if resident:
            return pl.BlockSpec((L,) + tail, lambda b, l: (0, 0, 0))
        return pl.BlockSpec((1,) + tail, lambda b, l: (l, 0, 0))

    kern = functools.partial(_encoder_kernel, n_head=n_head, d_k=d_k, d_v=d_v,
                             resident_weights=resident)
    out = pl.pallas_call(
        kern,
        grid=(B // bt, L),
        in_specs=[
            pl.BlockSpec((bt, N, 2), lambda b, l: (b, 0, 0)),
            pl.BlockSpec((bt, N, D), lambda b, l: (b, 0, 0)),
            pl.BlockSpec((bt, 1, N), lambda b, l: (b, 0, 0)),
            pl.BlockSpec((2, D), lambda b, l: (0, 0)),
            pl.BlockSpec((D, D), lambda b, l: (0, 0)),
            pl.BlockSpec((4, D), lambda b, l: (0, 0)),
            w_spec((D, HK)),
            w_spec((D, HK)),
            w_spec((D, HV)),
            w_spec((HV, D)),
            w_spec((D, d_inner)),
            w_spec((d_inner, D)),
            w_spec((5, D)),
            w_spec((1, d_inner)),
        ],
        out_specs=pl.BlockSpec((bt, N, D), lambda b, l: (b, 0, 0)),
        out_shape=jax.ShapeDtypeStruct((B, N, D), jnp.float32),
        scratch_shapes=[pltpu.VMEM((bt * N, D), jnp.float32),
                        pltpu.VMEM((bt, 1, N), jnp.float32)],
        compiler_params=pltpu.CompilerParams(
            dimension_semantics=("parallel", "arbitrary"),
            vmem_limit_bytes=vmem_limit),
    )(pos, feat, src_mask, packed["pe_w1"], packed["pe_w2"], packed["pe_vec"],
      packed["wq"], packed["wk"], packed["wv"], packed["wo"],
      packed["fw1"], packed["fw2"], packed["lvec"], packed["fb1"])
    return (out,)


# ----------------------------------------------------------------------------
# Pure-JAX f32 reference (same math as the PyTorch module, eval mode)
# ----------------------------------------------------------------------------
def _ln(x, g, b):
    mu = jnp.mean(x, -1, keepdims=True)
    var = jnp.mean((x - mu) ** 2, -1, keepdims=True)
    return (x - mu) / jnp.sqrt(var + 1e-6) * g + b


def reference_forward(src_seq, src_mask, params, *, n_head, d_k, d_v):
    pos, feat = src_seq[:, :, :2], src_seq[:, :, 2:]
    pe = jnp.maximum(pos @ params["pe_w1"] + params["pe_b1"], 0.0) @ params["pe_w2"] + params["pe_b2"]
    x = _ln(feat + pe, params["ln_g"], params["ln_b"])
    B, N, D = x.shape
    for lp in params["layers"]:
        q = (x @ lp["wq"]).reshape(B, N, n_head, d_k).transpose(0, 2, 1, 3)
        k = (x @ lp["wk"]).reshape(B, N, n_head, d_k).transpose(0, 2, 1, 3)
        v = (x @ lp["wv"]).reshape(B, N, n_head, d_v).transpose(0, 2, 1, 3)
        s = jnp.einsum("bhqd,bhkd->bhqk", q, k) / (d_k ** 0.5)
        s = jnp.where(src_mask[:, None, :, :] > 0, s, -1e9)
        s = s - jnp.max(s, -1, keepdims=True)
        p = jnp.exp(s) / jnp.sum(jnp.exp(s), -1, keepdims=True)
        o = jnp.einsum("bhqk,bhkd->bhqd", p, v).transpose(0, 2, 1, 3).reshape(B, N, n_head * d_v)
        y = _ln(o @ lp["wo"] + x, lp["ln1_g"], lp["ln1_b"])
        f = jnp.maximum(y @ lp["fw1"] + lp["fb1"], 0.0) @ lp["fw2"] + lp["fb2"]
        x = _ln(f + y, lp["ln2_g"], lp["ln2_b"])
    return x


# ----------------------------------------------------------------------------
if __name__ == "__main__":
    B, N = 2, 8
    d_model = d_word_vec = 32
    n_head, d_k, d_v = 2, 16, 16
    d_inner = 64
    n_layers = 2

    key = jax.random.PRNGKey(0)
    ks = iter(jax.random.split(key, 64))

    def rnd(shape, scale=0.05):
        return (scale * jax.random.normal(next(ks), shape)).astype(jnp.float32)

    params = {
        "pe_w1": rnd((2, d_model)), "pe_b1": rnd((d_model,)),
        "pe_w2": rnd((d_model, d_model)), "pe_b2": rnd((d_model,)),
        "ln_g": jnp.ones((d_model,), jnp.float32),
        "ln_b": jnp.zeros((d_model,), jnp.float32),
        "layers": [],
    }
    for _ in range(n_layers):
        params["layers"].append({
            "wq": rnd((d_model, n_head * d_k)),
            "wk": rnd((d_model, n_head * d_k)),
            "wv": rnd((d_model, n_head * d_v)),
            "wo": rnd((n_head * d_v, d_model)),
            "ln1_g": jnp.ones((d_model,), jnp.float32),
            "ln1_b": jnp.zeros((d_model,), jnp.float32),
            "fw1": rnd((d_model, d_inner)), "fb1": rnd((d_inner,)),
            "fw2": rnd((d_inner, d_model)), "fb2": rnd((d_model,)),
            "ln2_g": jnp.ones((d_model,), jnp.float32),
            "ln2_b": jnp.zeros((d_model,), jnp.float32),
        })

    # src_seq: (B, N, 2 + d_model); src_mask: (B, 1, N) key mask (1 = keep, 0 = pad)
    src_seq = jax.random.normal(next(ks), (B, N, 2 + d_model), dtype=jnp.float32)
    src_mask = jnp.ones((B, 1, N), jnp.float32).at[1, 0, N - 2:].set(0.0)

    packed = pack_encoder_params(params, n_head=n_head, d_k=d_k, d_v=d_v)  # one-time
    out = encoder_forward(src_seq, src_mask, packed,
                          n_head=n_head, d_k=d_k, d_v=d_v)[0]
    out = jax.block_until_ready(out)

    ref = reference_forward(src_seq, src_mask, params, n_head=n_head, d_k=d_k, d_v=d_v)
    max_err = float(jnp.max(jnp.abs(out - ref)))
    # bf16 matmul inputs + approx reciprocal => compare against f32 reference loosely
    assert jnp.allclose(out, ref, atol=3e-2, rtol=3e-2), f"mismatch vs JAX reference, max_err={max_err}"

    print("KERNEL_OK")
</pallas_src>

<mosaic_0001>
module attributes {stable_mosaic.version = 11 : i64} {
  func.func @_encoder_kernel(%arg0: i32, %arg1: i32, %arg2: memref<1x8x2xf32, #tpu.memory_space<vmem>>, %arg3: memref<1x8x32xf32, #tpu.memory_space<vmem>>, %arg4: memref<1x1x8xf32, #tpu.memory_space<vmem>>, %arg5: memref<2x32xf32, #tpu.memory_space<vmem>>, %arg6: memref<32x32xf32, #tpu.memory_space<vmem>>, %arg7: memref<4x32xf32, #tpu.memory_space<vmem>>, %arg8: memref<2x32x32xbf16, #tpu.memory_space<vmem>>, %arg9: memref<2x32x32xbf16, #tpu.memory_space<vmem>>, %arg10: memref<2x32x32xbf16, #tpu.memory_space<vmem>>, %arg11: memref<2x32x32xbf16, #tpu.memory_space<vmem>>, %arg12: memref<2x32x64xbf16, #tpu.memory_space<vmem>>, %arg13: memref<2x64x32xbf16, #tpu.memory_space<vmem>>, %arg14: memref<2x5x32xf32, #tpu.memory_space<vmem>>, %arg15: memref<2x1x64xf32, #tpu.memory_space<vmem>>, %arg16: memref<1x8x32xf32, #tpu.memory_space<vmem>>, %arg17: memref<8x32xf32, #tpu.memory_space<vmem>>, %arg18: memref<1x1x8xf32, #tpu.memory_space<vmem>>) attributes {dimension_semantics = [#tpu.dimension_semantics<parallel>, #tpu.dimension_semantics<arbitrary>], iteration_bounds = array<i64: 2, 2>, scalar_prefetch = 0 : i64, scratch_operands = 2 : i64, tpu.core_type = #tpu.core_type<tc>, window_params = [{transform_indices = @transform_0, window_bounds = array<i64: 1, 8, 2>}, {transform_indices = @transform_1, window_bounds = array<i64: 1, 8, 32>}, {transform_indices = @transform_2, window_bounds = array<i64: 1, 1, 8>}, {pipeline_mode = #tpu.pipeline_mode<synchronous>, transform_indices = @transform_3, window_bounds = array<i64: 2, 32>}, {pipeline_mode = #tpu.pipeline_mode<synchronous>, transform_indices = @transform_4, window_bounds = array<i64: 32, 32>}, {pipeline_mode = #tpu.pipeline_mode<synchronous>, transform_indices = @transform_5, window_bounds = array<i64: 4, 32>}, {pipeline_mode = #tpu.pipeline_mode<synchronous>, transform_indices = @transform_6, window_bounds = array<i64: 2, 32, 32>}, {pipeline_mode = #tpu.pipeline_mode<synchronous>, transform_indices = @transform_7, window_bounds = array<i64: 2, 32, 32>}, {pipeline_mode = #tpu.pipeline_mode<synchronous>, transform_indices = @transform_8, window_bounds = array<i64: 2, 32, 32>}, {pipeline_mode = #tpu.pipeline_mode<synchronous>, transform_indices = @transform_9, window_bounds = array<i64: 2, 32, 32>}, {pipeline_mode = #tpu.pipeline_mode<synchronous>, transform_indices = @transform_10, window_bounds = array<i64: 2, 32, 64>}, {pipeline_mode = #tpu.pipeline_mode<synchronous>, transform_indices = @transform_11, window_bounds = array<i64: 2, 64, 32>}, {pipeline_mode = #tpu.pipeline_mode<synchronous>, transform_indices = @transform_12, window_bounds = array<i64: 2, 5, 32>}, {pipeline_mode = #tpu.pipeline_mode<synchronous>, transform_indices = @transform_13, window_bounds = array<i64: 2, 1, 64>}, {transform_indices = @transform_14, window_bounds = array<i64: 1, 8, 32>}]} {
    %c0_i32 = arith.constant 0 : i32
    %0 = arith.cmpi eq, %arg1, %c0_i32 : i32
    %1 = arith.extui %0 : i1 to i32
    %c0_i32_0 = arith.constant 0 : i32
    %2 = arith.cmpi ne, %1, %c0_i32_0 : i32
    scf.if %2 {
      %c0_44 = arith.constant 0 : index
      %c0_45 = arith.constant 0 : index
      %c0_46 = arith.constant 0 : index
      %134 = vector.load %arg2[%c0_44, %c0_45, %c0_46] : memref<1x8x2xf32, #tpu.memory_space<vmem>>, vector<1x8x2xf32>
      %135 = vector.shape_cast %134 : vector<1x8x2xf32> to vector<8x2xf32>
      %c0_47 = arith.constant 0 : index
      %c0_48 = arith.constant 0 : index
      %c0_49 = arith.constant 0 : index
      %136 = vector.load %arg3[%c0_47, %c0_48, %c0_49] : memref<1x8x32xf32, #tpu.memory_space<vmem>>, vector<1x8x32xf32>
      %137 = vector.shape_cast %136 : vector<1x8x32xf32> to vector<8x32xf32>
      %c0_50 = arith.constant 0 : index
      %c0_51 = arith.constant 0 : index
      %138 = vector.load %arg7[%c0_50, %c0_51] : memref<4x32xf32, #tpu.memory_space<vmem>>, vector<4x32xf32>
      %139 = vector.extract_strided_slice %138 {offsets = [0, 0], sizes = [1, 32], strides = [1, 1]} : vector<4x32xf32> to vector<1x32xf32>
      %140 = vector.extract_strided_slice %138 {offsets = [1, 0], sizes = [1, 32], strides = [1, 1]} : vector<4x32xf32> to vector<1x32xf32>
      %141 = vector.extract_strided_slice %138 {offsets = [2, 0], sizes = [1, 32], strides = [1, 1]} : vector<4x32xf32> to vector<1x32xf32>
      %142 = vector.extract_strided_slice %138 {offsets = [3, 0], sizes = [1, 32], strides = [1, 1]} : vector<4x32xf32> to vector<1x32xf32>
      %c0_52 = arith.constant 0 : index
      %c0_53 = arith.constant 0 : index
      %143 = vector.load %arg5[%c0_52, %c0_53] : memref<2x32xf32, #tpu.memory_space<vmem>>, vector<2x32xf32>
      %cst_54 = arith.constant dense<0.000000e+00> : vector<8x32xf32>
      %144 = tpu.matmul %135, %143, %cst_54 {dimension_numbers = #tpu.dot_dimension_numbers<[1], [0], [0], [1], [0, 0, 1, 1], [], []>} : vector<8x2xf32>, vector<2x32xf32>, vector<8x32xf32> -> vector<8x32xf32>
      %145 = vector.broadcast %139 : vector<1x32xf32> to vector<8x32xf32>
      %146 = arith.addf %144, %145 : vector<8x32xf32>
      %cst_55 = arith.constant 0.000000e+00 : f32
      %147 = vector.broadcast %cst_55 : f32 to vector<8x32xf32>
      %148 = arith.maximumf %146, %147 : vector<8x32xf32>
      %c0_56 = arith.constant 0 : index
      %c0_57 = arith.constant 0 : index
      %149 = vector.load %arg6[%c0_56, %c0_57] : memref<32x32xf32, #tpu.memory_space<vmem>>, vector<32x32xf32>
      %cst_58 = arith.constant dense<0.000000e+00> : vector<8x32xf32>
      %150 = tpu.matmul %148, %149, %cst_58 {dimension_numbers = #tpu.dot_dimension_numbers<[1], [0], [0], [1], [0, 0, 1, 1], [], []>} : vector<8x32xf32>, vector<32x32xf32>, vector<8x32xf32> -> vector<8x32xf32>
      %151 = vector.broadcast %140 : vector<1x32xf32> to vector<8x32xf32>
      %152 = arith.addf %150, %151 : vector<8x32xf32>
      %153 = arith.addf %137, %152 : vector<8x32xf32>
      %cst_59 = arith.constant dense<0.000000e+00> : vector<8xf32>
      %154 = vector.multi_reduction <add>, %153, %cst_59 [1] : vector<8x32xf32> to vector<8xf32>
      %155 = vector.shape_cast %154 : vector<8xf32> to vector<8x1xf32>
      %cst_60 = arith.constant 3.200000e+01 : f32
      %156 = vector.broadcast %cst_60 : f32 to vector<8x1xf32>
      %157 = arith.divf %155, %156 : vector<8x1xf32>
      %158 = vector.broadcast %157 : vector<8x1xf32> to vector<8x32xf32>
      %159 = arith.subf %153, %158 : vector<8x32xf32>
      %160 = arith.mulf %159, %159 : vector<8x32xf32>
      %cst_61 = arith.constant dense<0.000000e+00> : vector<8xf32>
      %161 = vector.multi_reduction <add>, %160, %cst_61 [1] : vector<8x32xf32> to vector<8xf32>
      %162 = vector.shape_cast %161 : vector<8xf32> to vector<8x1xf32>
      %cst_62 = arith.constant 3.200000e+01 : f32
      %163 = vector.broadcast %cst_62 : f32 to vector<8x1xf32>
      %164 = arith.divf %162, %163 : vector<8x1xf32>
      %165 = vector.broadcast %157 : vector<8x1xf32> to vector<8x32xf32>
      %166 = arith.subf %153, %165 : vector<8x32xf32>
      %cst_63 = arith.constant 9.99999997E-7 : f32
      %167 = vector.broadcast %cst_63 : f32 to vector<8x1xf32>
      %168 = arith.addf %164, %167 : vector<8x1xf32>
      %169 = math.rsqrt %168 : vector<8x1xf32>
      %170 = vector.broadcast %169 : vector<8x1xf32> to vector<8x32xf32>
      %171 = arith.mulf %166, %170 : vector<8x32xf32>
      %172 = vector.broadcast %141 : vector<1x32xf32> to vector<8x32xf32>
      %173 = arith.mulf %171, %172 : vector<8x32xf32>
      %174 = vector.broadcast %142 : vector<1x32xf32> to vector<8x32xf32>
      %175 = arith.addf %173, %174 : vector<8x32xf32>
      %c0_64 = arith.constant 0 : index
      %c0_65 = arith.constant 0 : index
      %176 = vector.load %arg17[%c0_64, %c0_65] : memref<8x32xf32, #tpu.memory_space<vmem>>, vector<8x32xf32>
      tpu.vector_store %arg17[%c0_64, %c0_65], %175 {strides = array<i32>} : memref<8x32xf32, #tpu.memory_space<vmem>>, vector<8x32xf32>,
      %c0_66 = arith.constant 0 : index
      %c0_67 = arith.constant 0 : index
      %c0_68 = arith.constant 0 : index
      %177 = vector.load %arg4[%c0_66, %c0_67, %c0_68] : memref<1x1x8xf32, #tpu.memory_space<vmem>>, vector<1x1x8xf32>
      %cst_69 = arith.constant 0.000000e+00 : f32
      %178 = vector.broadcast %cst_69 : f32 to vector<1x1x8xf32>
      %179 = arith.cmpf ogt, %177, %178 : vector<1x1x8xf32>
      %cst_70 = arith.constant 0.000000e+00 : f32
      %cst_71 = arith.constant -1.000000e+09 : f32
      %180 = vector.broadcast %cst_70 : f32 to vector<1x1x8xf32>
      %181 = vector.broadcast %cst_71 : f32 to vector<1x1x8xf32>
      %182 = arith.select %179, %180, %181 : vector<1x1x8xi1>, vector<1x1x8xf32>
      %c0_72 = arith.constant 0 : index
      %c0_73 = arith.constant 0 : index
      %c0_74 = arith.constant 0 : index
      %183 = vector.load %arg18[%c0_72, %c0_73, %c0_74] : memref<1x1x8xf32, #tpu.memory_space<vmem>>, vector<1x1x8xf32>
      tpu.vector_store %arg18[%c0_72, %c0_73, %c0_74], %182 {strides = array<i32>} : memref<1x1x8xf32, #tpu.memory_space<vmem>>, vector<1x1x8xf32>,
    } else {
    }
    %c0 = arith.constant 0 : index
    %c0_1 = arith.constant 0 : index
    %3 = vector.load %arg17[%c0, %c0_1] : memref<8x32xf32, #tpu.memory_space<vmem>>, vector<8x32xf32>
    %4 = arith.index_cast %arg1 : i32 to index
    %c0_2 = arith.constant 0 : index
    %c0_3 = arith.constant 0 : index
    %5 = vector.load %arg14[%4, %c0_2, %c0_3] : memref<2x5x32xf32, #tpu.memory_space<vmem>>, vector<1x5x32xf32>
    %6 = vector.shape_cast %5 : vector<1x5x32xf32> to vector<5x32xf32>
    %7 = vector.extract_strided_slice %6 {offsets = [0, 0], sizes = [1, 32], strides = [1, 1]} : vector<5x32xf32> to vector<1x32xf32>
    %8 = vector.extract_strided_slice %6 {offsets = [1, 0], sizes = [1, 32], strides = [1, 1]} : vector<5x32xf32> to vector<1x32xf32>
    %9 = vector.extract_strided_slice %6 {offsets = [2, 0], sizes = [1, 32], strides = [1, 1]} : vector<5x32xf32> to vector<1x32xf32>
    %10 = vector.extract_strided_slice %6 {offsets = [3, 0], sizes = [1, 32], strides = [1, 1]} : vector<5x32xf32> to vector<1x32xf32>
    %11 = vector.extract_strided_slice %6 {offsets = [4, 0], sizes = [1, 32], strides = [1, 1]} : vector<5x32xf32> to vector<1x32xf32>
    %12 = arith.index_cast %arg1 : i32 to index
    %c0_4 = arith.constant 0 : index
    %c0_5 = arith.constant 0 : index
    %13 = vector.load %arg15[%12, %c0_4, %c0_5] : memref<2x1x64xf32, #tpu.memory_space<vmem>>, vector<1x1x64xf32>
    %14 = vector.shape_cast %13 : vector<1x1x64xf32> to vector<1x64xf32>
    %15 = arith.index_cast %arg1 : i32 to index
    %c0_6 = arith.constant 0 : index
    %c0_7 = arith.constant 0 : index
    %16 = vector.load %arg8[%15, %c0_6, %c0_7] : memref<2x32x32xbf16, #tpu.memory_space<vmem>>, vector<1x32x32xbf16>
    %17 = vector.shape_cast %16 : vector<1x32x32xbf16> to vector<32x32xbf16>
    %18 = arith.index_cast %arg1 : i32 to index
    %c0_8 = arith.constant 0 : index
    %c0_9 = arith.constant 0 : index
    %19 = vector.load %arg9[%18, %c0_8, %c0_9] : memref<2x32x32xbf16, #tpu.memory_space<vmem>>, vector<1x32x32xbf16>
    %20 = vector.shape_cast %19 : vector<1x32x32xbf16> to vector<32x32xbf16>
    %21 = arith.index_cast %arg1 : i32 to index
    %c0_10 = arith.constant 0 : index
    %c0_11 = arith.constant 0 : index
    %22 = vector.load %arg10[%21, %c0_10, %c0_11] : memref<2x32x32xbf16, #tpu.memory_space<vmem>>, vector<1x32x32xbf16>
    %23 = vector.shape_cast %22 : vector<1x32x32xbf16> to vector<32x32xbf16>
    %24 = arith.index_cast %arg1 : i32 to index
    %c0_12 = arith.constant 0 : index
    %c0_13 = arith.constant 0 : index
    %25 = vector.load %arg11[%24, %c0_12, %c0_13] : memref<2x32x32xbf16, #tpu.memory_space<vmem>>, vector<1x32x32xbf16>
    %26 = vector.shape_cast %25 : vector<1x32x32xbf16> to vector<32x32xbf16>
    %27 = arith.truncf %3 : vector<8x32xf32> to vector<8x32xbf16>
    %cst = arith.constant dense<0.000000e+00> : vector<8x32xf32>
    %28 = tpu.matmul %27, %17, %cst {dimension_numbers = #tpu.dot_dimension_numbers<[1], [0], [0], [1], [0, 0, 1, 1], [], []>} : vector<8x32xbf16>, vector<32x32xbf16>, vector<8x32xf32> -> vector<8x32xf32>
    %29 = arith.truncf %28 : vector<8x32xf32> to vector<8x32xbf16>
    %cst_14 = arith.constant dense<0.000000e+00> : vector<8x32xf32>
    %30 = tpu.matmul %27, %20, %cst_14 {dimension_numbers = #tpu.dot_dimension_numbers<[1], [0], [0], [1], [0, 0, 1, 1], [], []>} : vector<8x32xbf16>, vector<32x32xbf16>, vector<8x32xf32> -> vector<8x32xf32>
    %31 = arith.truncf %30 : vector<8x32xf32> to vector<8x32xbf16>
    %cst_15 = arith.constant dense<0.000000e+00> : vector<8x32xf32>
    %32 = tpu.matmul %27, %23, %cst_15 {dimension_numbers = #tpu.dot_dimension_numbers<[1], [0], [0], [1], [0, 0, 1, 1], [], []>} : vector<8x32xbf16>, vector<32x32xbf16>, vector<8x32xf32> -> vector<8x32xf32>
    %33 = arith.truncf %32 : vector<8x32xf32> to vector<8x32xbf16>
    %34 = vector.shape_cast %29 : vector<8x32xbf16> to vector<1x8x2x16xbf16>
    %35 = tpu.transpose %34, [0, 2, 1, 3] : vector<1x8x2x16xbf16> -> vector<1x2x8x16xbf16>
    %36 = vector.shape_cast %35 : vector<1x2x8x16xbf16> to vector<2x8x16xbf16>
    %37 = vector.shape_cast %31 : vector<8x32xbf16> to vector<1x8x2x16xbf16>
    %38 = tpu.transpose %37, [0, 2, 1, 3] : vector<1x8x2x16xbf16> -> vector<1x2x8x16xbf16>
    %39 = vector.shape_cast %38 : vector<1x2x8x16xbf16> to vector<2x8x16xbf16>
    %40 = vector.shape_cast %33 : vector<8x32xbf16> to vector<1x8x2x16xbf16>
    %41 = tpu.transpose %40, [0, 2, 1, 3] : vector<1x8x2x16xbf16> -> vector<1x2x8x16xbf16>
    %42 = vector.shape_cast %41 : vector<1x2x8x16xbf16> to vector<2x8x16xbf16>
    %c0_16 = arith.constant 0 : index
    %c0_17 = arith.constant 0 : index
    %c0_18 = arith.constant 0 : index
    %43 = vector.load %arg18[%c0_16, %c0_17, %c0_18] : memref<1x1x8xf32, #tpu.memory_space<vmem>>, vector<1x1x8xf32>
    %44 = vector.shape_cast %43 : vector<1x1x8xf32> to vector<1x1x1x8xf32>
    %45 = vector.shape_cast %44 : vector<1x1x1x8xf32> to vector<1x1x1x8xf32>
    %46 = vector.broadcast %45 : vector<1x1x1x8xf32> to vector<1x2x1x8xf32>
    %47 = vector.shape_cast %46 : vector<1x2x1x8xf32> to vector<2x1x8xf32>
    "tpu.trace_start"() <{level = 10 : i32, message = "Bqd,Bkd->Bqk"}> : () -> ()
    %cst_19 = arith.constant dense<0.000000e+00> : vector<2x8x8xf32>
    %48 = tpu.matmul %36, %39, %cst_19 {dimension_numbers = #tpu.dot_dimension_numbers<[2], [2], [1], [1], [0, 0, 0, 1, 1, 1], [0], [0]>} : vector<2x8x16xbf16>, vector<2x8x16xbf16>, vector<2x8x8xf32> -> vector<2x8x8xf32>
    "tpu.trace_stop"() : () -> ()
    %49 = vector.broadcast %47 : vector<2x1x8xf32> to vector<2x8x8xf32>
    %50 = arith.addf %48, %49 : vector<2x8x8xf32>
    %cst_20 = arith.constant dense<0xFF800000> : vector<2x8xf32>
    %51 = vector.multi_reduction <maximumf>, %50, %cst_20 [2] : vector<2x8x8xf32> to vector<2x8xf32>
    %52 = vector.shape_cast %51 : vector<2x8xf32> to vector<2x8x1xf32>
    %53 = vector.broadcast %52 : vector<2x8x1xf32> to vector<2x8x8xf32>
    %54 = arith.subf %50, %53 : vector<2x8x8xf32>
    %55 = math.exp %54 : vector<2x8x8xf32>
    %cst_21 = arith.constant dense<0.000000e+00> : vector<2x8xf32>
    %56 = vector.multi_reduction <add>, %55, %cst_21 [2] : vector<2x8x8xf32> to vector<2x8xf32>
    %57 = vector.shape_cast %56 : vector<2x8xf32> to vector<2x8x1xf32>
    %58 = tpu.reciprocal %57 {approx = true} : vector<2x8x1xf32> -> vector<2x8x1xf32>
    %59 = vector.broadcast %58 : vector<2x8x1xf32> to vector<2x8x8xf32>
    %60 = arith.mulf %55, %59 : vector<2x8x8xf32>
    %61 = arith.truncf %60 : vector<2x8x8xf32> to vector<2x8x8xbf16>
    "tpu.trace_start"() <{level = 10 : i32, message = "Bqk,Bkd->Bqd"}> : () -> ()
    %cst_22 = arith.constant dense<0.000000e+00> : vector<2x8x16xf32>
    %62 = tpu.matmul %61, %42, %cst_22 {dimension_numbers = #tpu.dot_dimension_numbers<[2], [1], [1], [2], [0, 0, 0, 1, 1, 2], [0], [0]>} : vector<2x8x8xbf16>, vector<2x8x16xbf16>, vector<2x8x16xf32> -> vector<2x8x16xf32>
    "tpu.trace_stop"() : () -> ()
    %63 = vector.shape_cast %62 : vector<2x8x16xf32> to vector<1x2x8x16xf32>
    %64 = tpu.transpose %63, [0, 2, 1, 3] : vector<1x2x8x16xf32> -> vector<1x8x2x16xf32>
    %65 = vector.shape_cast %64 : vector<1x8x2x16xf32> to vector<8x32xf32>
    %66 = arith.truncf %65 : vector<8x32xf32> to vector<8x32xbf16>
    %cst_23 = arith.constant dense<0.000000e+00> : vector<8x32xf32>
    %67 = tpu.matmul %66, %26, %cst_23 {dimension_numbers = #tpu.dot_dimension_numbers<[1], [0], [0], [1], [0, 0, 1, 1], [], []>} : vector<8x32xbf16>, vector<32x32xbf16>, vector<8x32xf32> -> vector<8x32xf32>
    %68 = arith.addf %67, %3 : vector<8x32xf32>
    %cst_24 = arith.constant dense<0.000000e+00> : vector<8xf32>
    %69 = vector.multi_reduction <add>, %68, %cst_24 [1] : vector<8x32xf32> to vector<8xf32>
    %70 = vector.shape_cast %69 : vector<8xf32> to vector<8x1xf32>
    %cst_25 = arith.constant 3.200000e+01 : f32
    %71 = vector.broadcast %cst_25 : f32 to vector<8x1xf32>
    %72 = arith.divf %70, %71 : vector<8x1xf32>
    %73 = vector.broadcast %72 : vector<8x1xf32> to vector<8x32xf32>
    %74 = arith.subf %68, %73 : vector<8x32xf32>
    %75 = arith.mulf %74, %74 : vector<8x32xf32>
    %cst_26 = arith.constant dense<0.000000e+00> : vector<8xf32>
    %76 = vector.multi_reduction <add>, %75, %cst_26 [1] : vector<8x32xf32> to vector<8xf32>
    %77 = vector.shape_cast %76 : vector<8xf32> to vector<8x1xf32>
    %cst_27 = arith.constant 3.200000e+01 : f32
    %78 = vector.broadcast %cst_27 : f32 to vector<8x1xf32>
    %79 = arith.divf %77, %78 : vector<8x1xf32>
    %80 = vector.broadcast %72 : vector<8x1xf32> to vector<8x32xf32>
    %81 = arith.subf %68, %80 : vector<8x32xf32>
    %cst_28 = arith.constant 9.99999997E-7 : f32
    %82 = vector.broadcast %cst_28 : f32 to vector<8x1xf32>
    %83 = arith.addf %79, %82 : vector<8x1xf32>
    %84 = math.rsqrt %83 : vector<8x1xf32>
    %85 = vector.broadcast %84 : vector<8x1xf32> to vector<8x32xf32>
    %86 = arith.mulf %81, %85 : vector<8x32xf32>
    %87 = vector.broadcast %7 : vector<1x32xf32> to vector<8x32xf32>
    %88 = arith.mulf %86, %87 : vector<8x32xf32>
    %89 = vector.broadcast %8 : vector<1x32xf32> to vector<8x32xf32>
    %90 = arith.addf %88, %89 : vector<8x32xf32>
    %91 = arith.truncf %90 : vector<8x32xf32> to vector<8x32xbf16>
    %92 = arith.index_cast %arg1 : i32 to index
    %c0_29 = arith.constant 0 : index
    %c0_30 = arith.constant 0 : index
    %93 = vector.load %arg12[%92, %c0_29, %c0_30] : memref<2x32x64xbf16, #tpu.memory_space<vmem>>, vector<1x32x64xbf16>
    %94 = vector.shape_cast %93 : vector<1x32x64xbf16> to vector<32x64xbf16>
    %cst_31 = arith.constant dense<0.000000e+00> : vector<8x64xf32>
    %95 = tpu.matmul %91, %94, %cst_31 {dimension_numbers = #tpu.dot_dimension_numbers<[1], [0], [0], [1], [0, 0, 1, 1], [], []>} : vector<8x32xbf16>, vector<32x64xbf16>, vector<8x64xf32> -> vector<8x64xf32>
    %96 = vector.broadcast %14 : vector<1x64xf32> to vector<8x64xf32>
    %97 = arith.addf %95, %96 : vector<8x64xf32>
    %cst_32 = arith.constant 0.000000e+00 : f32
    %98 = vector.broadcast %cst_32 : f32 to vector<8x64xf32>
    %99 = arith.maximumf %97, %98 : vector<8x64xf32>
    %100 = arith.truncf %99 : vector<8x64xf32> to vector<8x64xbf16>
    %101 = arith.index_cast %arg1 : i32 to index
    %c0_33 = arith.constant 0 : index
    %c0_34 = arith.constant 0 : index
    %102 = vector.load %arg13[%101, %c0_33, %c0_34] : memref<2x64x32xbf16, #tpu.memory_space<vmem>>, vector<1x64x32xbf16>
    %103 = vector.shape_cast %102 : vector<1x64x32xbf16> to vector<64x32xbf16>
    %cst_35 = arith.constant dense<0.000000e+00> : vector<8x32xf32>
    %104 = tpu.matmul %100, %103, %cst_35 {dimension_numbers = #tpu.dot_dimension_numbers<[1], [0], [0], [1], [0, 0, 1, 1], [], []>} : vector<8x64xbf16>, vector<64x32xbf16>, vector<8x32xf32> -> vector<8x32xf32>
    %105 = vector.broadcast %9 : vector<1x32xf32> to vector<8x32xf32>
    %106 = arith.addf %104, %105 : vector<8x32xf32>
    %107 = arith.addf %106, %90 : vector<8x32xf32>
    %cst_36 = arith.constant dense<0.000000e+00> : vector<8xf32>
    %108 = vector.multi_reduction <add>, %107, %cst_36 [1] : vector<8x32xf32> to vector<8xf32>
    %109 = vector.shape_cast %108 : vector<8xf32> to vector<8x1xf32>
    %cst_37 = arith.constant 3.200000e+01 : f32
    %110 = vector.broadcast %cst_37 : f32 to vector<8x1xf32>
    %111 = arith.divf %109, %110 : vector<8x1xf32>
    %112 = vector.broadcast %111 : vector<8x1xf32> to vector<8x32xf32>
    %113 = arith.subf %107, %112 : vector<8x32xf32>
    %114 = arith.mulf %113, %113 : vector<8x32xf32>
    %cst_38 = arith.constant dense<0.000000e+00> : vector<8xf32>
    %115 = vector.multi_reduction <add>, %114, %cst_38 [1] : vector<8x32xf32> to vector<8xf32>
    %116 = vector.shape_cast %115 : vector<8xf32> to vector<8x1xf32>
    %cst_39 = arith.constant 3.200000e+01 : f32
    %117 = vector.broadcast %cst_39 : f32 to vector<8x1xf32>
    %118 = arith.divf %116, %117 : vector<8x1xf32>
    %119 = vector.broadcast %111 : vector<8x1xf32> to vector<8x32xf32>
    %120 = arith.subf %107, %119 : vector<8x32xf32>
    %cst_40 = arith.constant 9.99999997E-7 : f32
    %121 = vector.broadcast %cst_40 : f32 to vector<8x1xf32>
    %122 = arith.addf %118, %121 : vector<8x1xf32>
    %123 = math.rsqrt %122 : vector<8x1xf32>
    %124 = vector.broadcast %123 : vector<8x1xf32> to vector<8x32xf32>
    %125 = arith.mulf %120, %124 : vector<8x32xf32>
    %126 = vector.broadcast %10 : vector<1x32xf32> to vector<8x32xf32>
    %127 = arith.mulf %125, %126 : vector<8x32xf32>
    %128 = vector.broadcast %11 : vector<1x32xf32> to vector<8x32xf32>
    %129 = arith.addf %127, %128 : vector<8x32xf32>
    %c0_41 = arith.constant 0 : index
    %c0_42 = arith.constant 0 : index
    %130 = vector.load %arg17[%c0_41, %c0_42] : memref<8x32xf32, #tpu.memory_space<vmem>>, vector<8x32xf32>
    tpu.vector_store %arg17[%c0_41, %c0_42], %129 {strides = array<i32>} : memref<8x32xf32, #tpu.memory_space<vmem>>, vector<8x32xf32>,
    %c1_i32 = arith.constant 1 : i32
    %131 = arith.cmpi eq, %arg1, %c1_i32 : i32
    %132 = arith.extui %131 : i1 to i32
    %c0_i32_43 = arith.constant 0 : i32
    %133 = arith.cmpi ne, %132, %c0_i32_43 : i32
    scf.if %133 {
      %134 = vector.shape_cast %129 : vector<8x32xf32> to vector<1x8x32xf32>
      %c0_44 = arith.constant 0 : index
      %c0_45 = arith.constant 0 : index
      %c0_46 = arith.constant 0 : index
      %135 = vector.load %arg16[%c0_44, %c0_45, %c0_46] : memref<1x8x32xf32, #tpu.memory_space<vmem>>, vector<1x8x32xf32>
      tpu.vector_store %arg16[%c0_44, %c0_45, %c0_46], %134 {strides = array<i32>} : memref<1x8x32xf32, #tpu.memory_space<vmem>>, vector<1x8x32xf32>,
    } else {
    }
    return
  }
  func.func @transform_0(%arg0: i32, %arg1: i32) -> (i32, i32, i32) {
    %c0_i32 = arith.constant 0 : i32
    %c0_i32_0 = arith.constant 0 : i32
    %c0_i32_1 = arith.constant 0 : i32
    return %arg0, %c0_i32, %c0_i32_0 : i32, i32, i32
  }
  func.func @transform_1(%arg0: i32, %arg1: i32) -> (i32, i32, i32) {
    %c0_i32 = arith.constant 0 : i32
    %c0_i32_0 = arith.constant 0 : i32
    %c0_i32_1 = arith.constant 0 : i32
    return %arg0, %c0_i32, %c0_i32_0 : i32, i32, i32
  }
  func.func @transform_2(%arg0: i32, %arg1: i32) -> (i32, i32, i32) {
    %c0_i32 = arith.constant 0 : i32
    %c0_i32_0 = arith.constant 0 : i32
    %c0_i32_1 = arith.constant 0 : i32
    return %arg0, %c0_i32, %c0_i32_0 : i32, i32, i32
  }
  func.func @transform_3(%arg0: i32, %arg1: i32) -> (i32, i32) {
    %c0_i32 = arith.constant 0 : i32
    %c0_i32_0 = arith.constant 0 : i32
    %c0_i32_1 = arith.constant 0 : i32
    return %c0_i32, %c0_i32_0 : i32, i32
  }
  func.func @transform_4(%arg0: i32, %arg1: i32) -> (i32, i32) {
    %c0_i32 = arith.constant 0 : i32
    %c0_i32_0 = arith.constant 0 : i32
    %c0_i32_1 = arith.constant 0 : i32
    return %c0_i32, %c0_i32_0 : i32, i32
  }
  func.func @transform_5(%arg0: i32, %arg1: i32) -> (i32, i32) {
    %c0_i32 = arith.constant 0 : i32
    %c0_i32_0 = arith.constant 0 : i32
    %c0_i32_1 = arith.constant 0 : i32
    return %c0_i32, %c0_i32_0 : i32, i32
  }
  func.func @transform_6(%arg0: i32, %arg1: i32) -> (i32, i32, i32) {
    %c0_i32 = arith.constant 0 : i32
    %c0_i32_0 = arith.constant 0 : i32
    %c0_i32_1 = arith.constant 0 : i32
    %c0_i32_2 = arith.constant 0 : i32
    return %c0_i32, %c0_i32_0, %c0_i32_1 : i32, i32, i32
  }
  func.func @transform_7(%arg0: i32, %arg1: i32) -> (i32, i32, i32) {
    %c0_i32 = arith.constant 0 : i32
    %c0_i32_0 = arith.constant 0 : i32
    %c0_i32_1 = arith.constant 0 : i32
    %c0_i32_2 = arith.constant 0 : i32
    return %c0_i32, %c0_i32_0, %c0_i32_1 : i32, i32, i32
  }
  func.func @transform_8(%arg0: i32, %arg1: i32) -> (i32, i32, i32) {
    %c0_i32 = arith.constant 0 : i32
    %c0_i32_0 = arith.constant 0 : i32
    %c0_i32_1 = arith.constant 0 : i32
    %c0_i32_2 = arith.constant 0 : i32
    return %c0_i32, %c0_i32_0, %c0_i32_1 : i32, i32, i32
  }
  func.func @transform_9(%arg0: i32, %arg1: i32) -> (i32, i32, i32) {
    %c0_i32 = arith.constant 0 : i32
    %c0_i32_0 = arith.constant 0 : i32
    %c0_i32_1 = arith.constant 0 : i32
    %c0_i32_2 = arith.constant 0 : i32
    return %c0_i32, %c0_i32_0, %c0_i32_1 : i32, i32, i32
  }
  func.func @transform_10(%arg0: i32, %arg1: i32) -> (i32, i32, i32) {
    %c0_i32 = arith.constant 0 : i32
    %c0_i32_0 = arith.constant 0 : i32
    %c0_i32_1 = arith.constant 0 : i32
    %c0_i32_2 = arith.constant 0 : i32
    return %c0_i32, %c0_i32_0, %c0_i32_1 : i32, i32, i32
  }
  func.func @transform_11(%arg0: i32, %arg1: i32) -> (i32, i32, i32) {
    %c0_i32 = arith.constant 0 : i32
    %c0_i32_0 = arith.constant 0 : i32
    %c0_i32_1 = arith.constant 0 : i32
    %c0_i32_2 = arith.constant 0 : i32
    return %c0_i32, %c0_i32_0, %c0_i32_1 : i32, i32, i32
  }
  func.func @transform_12(%arg0: i32, %arg1: i32) -> (i32, i32, i32) {
    %c0_i32 = arith.constant 0 : i32
    %c0_i32_0 = arith.constant 0 : i32
    %c0_i32_1 = arith.constant 0 : i32
    %c0_i32_2 = arith.constant 0 : i32
    return %c0_i32, %c0_i32_0, %c0_i32_1 : i32, i32, i32
  }
  func.func @transform_13(%arg0: i32, %arg1: i32) -> (i32, i32, i32) {
    %c0_i32 = arith.constant 0 : i32
    %c0_i32_0 = arith.constant 0 : i32
    %c0_i32_1 = arith.constant 0 : i32
    %c0_i32_2 = arith.constant 0 : i32
    return %c0_i32, %c0_i32_0, %c0_i32_1 : i32, i32, i32
  }
  func.func @transform_14(%arg0: i32, %arg1: i32) -> (i32, i32, i32) {
    %c0_i32 = arith.constant 0 : i32
    %c0_i32_0 = arith.constant 0 : i32
    %c0_i32_1 = arith.constant 0 : i32
    return %arg0, %c0_i32, %c0_i32_0 : i32, i32, i32
  }
}

</mosaic_0001>

<bundles_post_ra>
// kernel: tpu_custom_call.1
= control target key start
LH: loop header
LB: loop body
LE: loop exit
PB: predicated region body
PF: predicated region fallthrough
CT: control target
= control target key end

     0   :  { %s2604_s0 = inlined_call_operand.vmem [shape: f32[2,8,2], index: 0, kind: input, shape index: {}]   ;;  %s2605_s1 = inlined_call_operand.hbm [shape: f32[2,8,32], index: 1, kind: input, shape index: {}]   ;;  %s2606_s2 = inlined_call_operand.vmem [shape: f32[2,1,8], index: 2, kind: input, shape index: {}]   ;;  %s2607_s3 = inlined_call_operand.vmem [shape: f32[2,32], index: 3, kind: input, shape index: {}]   ;;  %s2608_s4 = inlined_call_operand.vmem [shape: f32[32,32], index: 4, kind: input, shape index: {}]   ;;  %s2609_s5 = inlined_call_operand.vmem [shape: f32[4,32], index: 5, kind: input, shape index: {}]   ;;  %s2610_s6 = inlined_call_operand.vmem [shape: bf16[2,32,32], index: 6, kind: input, shape index: {}]   ;;  %s2611_s7 = inlined_call_operand.vmem [shape: bf16[2,32,32], index: 7, kind: input, shape index: {}]   ;;  %s2612_s8 = inlined_call_operand.hbm [shape: bf16[2,32,32], index: 8, kind: input, shape index: {}]   ;;  %s2613_s9 = inlined_call_operand.hbm [shape: bf16[2,32,32], index: 9, kind: input, shape index: {}]   ;;  %s2614_s10 = inlined_call_operand.hbm [shape: bf16[2,32,64], index: 10, kind: input, shape index: {}]   ;;  %s2615_s11 = inlined_call_operand.vmem [shape: bf16[2,64,32], index: 11, kind: input, shape index: {}]   ;;  %s2616_s12 = inlined_call_operand.vmem [shape: f32[2,5,32], index: 12, kind: input, shape index: {}]   ;;  %s2617_s13 = inlined_call_operand.vmem [shape: f32[2,1,64], index: 13, kind: input, shape index: {}]   ;;  %s2618_s14 = inlined_call_operand.hbm [shape: f32[2,8,32], index: 14, kind: output, shape index: {}]  }
   0x1   :  { %2625 = sst [smem:[#allocation21_spill]] %s2610_s6 }
   0x2   :  { %2626 = sst [smem:[#allocation22_spill]] %s2611_s7 }
   0x3   :  { %2627 = sst [smem:[#allocation23_spill]] %s2612_s8 }
   0x4   :  { %2628 = sst [smem:[#allocation24_spill]] %s2613_s9 }
   0x5   :  { %2629 = sst [smem:[#allocation25_spill]] %s2614_s10 }
   0x6   :  { %2630 = sst [smem:[#allocation26_spill]] %s2615_s11 }
   0x7   :  { %2631 = sst [smem:[#allocation27_spill]] %s2616_s12 }
   0x8   :  { %2632 = sst [smem:[#allocation28_spill]] %s2617_s13 }
   0x9   :  { %2633 = sst [smem:[#allocation29_spill]] %s2618_s14 }
   0xa   :  { %19 = vsyncpa [#allocation5], 0 }
   0xb   :  { %21 = vsyncpa [#allocation5 + $0x1], 0 }
   0xc   :  { %22 = vsyncpa [#allocation8], 0 }
   0xd   :  { %23 = vsyncpa [#allocation11], 0 }
   0xe   :  { %24 = vsyncpa [#allocation6], 0 }
   0xf   :  { %26 = vsyncpa [#allocation6 + $0x1], 0  ;;  %s2186_s29 = smov 0   ;;  %s2188_s30 = smov 0  }
  0x10   :  { %s2190_s15 = smov 0   ;;  %s2192_s16 = smov 0  }
  0x11   :  { %s2194_s17 = smov 0   ;;  %s2196_s18 = smov 0  }
  0x12   :  { %s2198_s19 = smov 0   ;;  %s2200_s20 = smov 0  }
  0x13 LB: > { %2634 = sst [smem:[#allocation17_spill]] %s2069_s29  ;;  %s2619_s21 = sadd.s32 4294967295, %s2097_s20   ;;  %s2097_s20 = sphi %s2200_s20, %s32_s20   ;;  %s2093_s19 = sphi %s2198_s19, %s2663_s19   ;;  %s2089_s18 = sphi %s2196_s18, %s2658_s18   ;;  %s2085_s17 = sphi %s2194_s17, %s2662_s17   ;;  %s2081_s16 = sphi %s2192_s16, %s2657_s16   ;;  %s2077_s15 = sphi %s2190_s15, %s2661_s15   ;;  %s2073_s30 = sphi %s2188_s30, %s2660_s30   ;;  %s2069_s29 = sphi %s2186_s29, %s2659_s29  }
  0x14   : > { %2635 = sst [smem:[#allocation18_spill]] %s2089_s18  ;;  %p1616_p0 = scmp.ge.s32.totalorder %s2097_s20, 1 }
  0x15   : > { %p2230_p1 = scmp.eq.s32.totalorder %s2619_s21, 0  ;;  %p384_p2 = scmp.lt.s32.totalorder %s2097_s20, 5 }
  0x16   : > { %s2637_s8 = sld [smem:[#allocation23_spill]]  ;;  %s2099_s27 = smov [#allocation7]  }
  0x17   : > { %p2238_p3 = pnand %p1616_p0, %p384_p2  ;;  %s412_s28 = sshll.u32 %s2099_s27, 4  ;;  %s413_s28 = int_to_ptr.vmem [resolvable:$true] %s412_s28 }
  0x18   : > { %s2640_s9 = sld [smem:[#allocation24_spill]]  ;;  %s2100_s24 = smov 64  }
  0x19   : > { %p1749_p4 = pneg %p2238_p3  ;;  %s2102_s27 = smov [#allocation9]  }
  0x1a   : > { %s426_s11 = sshll.u32 %s2102_s27, 4  ;;  %s2641_s10 = sld [smem:[#allocation25_spill]]  ;;  %s427_s11 = int_to_ptr.vmem [resolvable:$true] %s426_s11 }
  0x1b   : > { %p2246_p5 = pnand %p1749_p4, %p2230_p1  ;;  %s44_s27 = sadd.s32 1, %s2093_s19 }
  0x1c   : > { %s410_s25 = sshll.u32 %s2637_s8, 4  ;;  %s2101_s8 = smov 4   ;;  %s411_s25 = int_to_ptr.hbm [resolvable:$true] %s410_s25 }
  0x1d   : > { %1752 = dma.hbm_to_vmem [thread:$0]  (!%p2246_p5), %s411_s25, 512, %s413_s28, [#allocation8], %s2100_s24, %s2100_s24, %s2101_s8  }
  0x1e   : > { %s424_s23 = sshll.u32 %s2640_s9, 4  ;;  %s2103_s9 = smov [#allocation10]   ;;  %s425_s23 = int_to_ptr.hbm [resolvable:$true] %s424_s23 }
  0x1f   : > { %1755 = dma.hbm_to_vmem [thread:$0]  (!%p2246_p5), %s425_s23, 512, %s427_s11, [#allocation8], %s2100_s24, %s2100_s24, %s2101_s8  }
  0x20   : > { %s438_s14 = sshll.u32 %s2641_s10, 4  ;;  %s440_s6 = sshll.u32 %s2103_s9, 4  ;;  %s439_s14 = int_to_ptr.hbm [resolvable:$true] %s438_s14  ;;  %s441_s6 = int_to_ptr.vmem [resolvable:$true] %s440_s6 }
  0x21   : > { %1758 = dma.hbm_to_vmem [thread:$0]  (!%p2246_p5), %s439_s14, 512, %s441_s6, [#allocation11], %s2100_s24, %s2100_s24, %s2101_s8  }
  0x22   : > { %s1615_s25 = sadd.s32 4294967294, %s2097_s20   ;;  %s41_s28 = sadd.s32 1, %s2089_s18 }
  0x23   : > { %p42_p6 = scmp.ge.s32.totalorder %s41_s28, 2  ;;  %s77_s13 = sadd.s32 1, %s2077_s15 }
  0x24   : > { %p84_p7 = scmp.ne.s32.totalorder %s2077_s15, %s2073_s30  ;;  %p85_p8 = scmp.eq.s32.totalorder %s2097_s20, 0 }
  0x25   : > { %s2665_s28 = smov (%p42_p6, %s41_s28), 0  ;;  %s2667_s27 = smov (!%p42_p6, %s44_s27), %s2093_s19 }
  0x26   : > { %2642 = sst [smem:[#allocation19_spill]] %s2665_s28  ;;  %p2272_p9 = por %p85_p8, %p84_p7 }
  0x27   : > { %p90_p10 = scmp.ne.s32.totalorder %s2073_s30, %s2069_s29  ;;  %p46_p11 = scmp.ge.s32.totalorder %s2667_s27, 2 }
  0x28   : > { %s2644_s6 = sadd.s32 4294967295, %s2097_s20   ;;  %p377_p0 = scmp.eq.s32.totalorder %s1615_s25, 3 }
  0x29   : > { %p371_p12 = scmp.eq.s32.totalorder %s2644_s6, 3  ;;  %p2282_p13 = por %p2230_p1, %p90_p10 }
  0x2a   : > { %s2669_s27 = smov (%p46_p11, %s2667_s27), 0  ;;  %p2292_p4 = por %p377_p0, %p90_p10 }
  0x2b   : > { %p2288_p2 = por %p371_p12, %p84_p7  ;;  %s74_s23 = ssub.s32 %s2093_s19, %s2669_s27 }
  0x2c   : > { %s2647_s21 = scalar_select %p2292_p4, 1, 0 }
  0x2d   : > { %p1770_p5 = scmp.lt.s32.totalorder %s2097_s20, 4  ;;  %p75_p6 = scmp.eq.s32.totalorder %s74_s23, 0 }
  0x2e   : > { %2648 = sst [smem:[#allocation20_spill]] %s2647_s21  ;;  %s470_s24 = sand.u32 1, %s2077_s15  }
  0x2f   : > { %s1621_s12 = sshll.u32 %s470_s24, 3  ;;  %s1622_s25 = sshll.u32 %s2093_s19, 3 }
  0x30   : > { %s2301_s14 = scalar_select %p75_p6, %s2077_s15, %s77_s13  }
  0x31   : > { %s478_s28 = scalar_lea.hbm %s2605_s1, %s1622_s25  ;;  %s474_s18 = scalar_lea.vmem [#allocation4], %s1621_s12 }
  0x32   : > { %s482_s29 = sshll.u32 %s474_s18, 4  ;;  %s480_s7 = sshll.u32 %s478_s28, 4  ;;  %s483_s29 = int_to_ptr.vmem [resolvable:$true] %s482_s29  ;;  %s481_s7 = int_to_ptr.hbm [resolvable:$true] %s480_s7 }
  0x33   : > { %p1760_p7 = pnand %p1770_p5, %p2272_p9  ;;  %s471_s21 = scalar_lea.sflag [#allocation5], %s470_s24 }
  0x34   : > { %497 = sbr.rel (%p2238_p3) target bundleno = 2511 (0x9cf), region = 76  ;;  %s2312_s13 = sand.u32 (!%p2238_p3), 1, %s2073_s30  }
  0x35   : > { %1762 = dma.hbm_to_vmem [thread:$0]  (!%p1760_p7), %s481_s7, 128, %s483_s29, %s471_s21  }
  0x36   : > { %s1624_s10 = sshll.u32 (!%p2238_p3), %s2312_s13, 3  ;;  %s500_s23 = scalar_lea.sflag (!%p2238_p3), [#allocation5], %s2312_s13 }
  0x37   : > { %s2316_s12 = scalar_lea.vmem (!%p2238_p3), [#allocation4], %s1624_s10 }
  0x39   : > { %2052 = dma.done.wait (%p2282_p13), %s500_s23, 128  }
  0x3a   : > { %2054 = vsyncadd (%p2282_p13), %s500_s23, 4294967168 }
  0x3b   : > { %2056 = dma.done.wait (%p2230_p1), [#allocation8], 1024  }
  0x3c   : > { %2058 = vsyncadd (%p2230_p1), [#allocation8], 4294966272 }
  0x3d   : > { %2060 = dma.done.wait (%p2230_p1), [#allocation11], 512  }
  0x3e   : > { %2062 = vsyncadd (%p2230_p1), [#allocation11], 4294966784  ;;  %p571_p3 = scmp.lt.s32.totalorder %s2085_s17, 1  ;;  %s2342_s24 = scalar_lea.vmem [#allocation12], %s1624_s10 }
  0x3f   : > { %p1630_p1 = scmp.ne.s32.totalorder %s2081_s16, 0 }
  0x40   : > { %s2332_s7 = scalar_select %p571_p3, %s2085_s17, 1 }
  0x41   : > { %582 = sbr.rel (%p1630_p1) target bundleno = 601 (0x259), region = 96 }
  0x42   : > { %s1629_s29 = sshll.u32 %s2332_s7, 3  ;;  %s577_s28 = scalar_lea.vmem %s2606_s2, %s2332_s7 }
  0x43   : > { %s574_s21 = scalar_lea.vmem %s2604_s0, %s1629_s29 }
  0x46   : > { %v586_v0 = vld [vmem:[%s2607_s3] sm:$0x3]  ;;  %vm592_vm0 = vcmask 1041408   ;;  %vm588_vm1 = vcmask 15360   ;;  %v620_v2 = vld [vmem:[%s2608_s4 + $0x18] sm:$0xff]  ;;  %v619_v3 = vld [vmem:[%s2608_s4 + $0x10] sm:$0xff] }
  0x47   : > { %v583_v1 = vld [vmem:[%s574_s21] sm:$0xff]  ;;  %1631 = vmatpush.msk.msra.mxu0 %vm592_vm0, %v586_v0  ;;  %638 = vmatpush.msra.mxu1 %v620_v2  ;;  %v618_v4 = vld [vmem:[%s2608_s4 + $0x8] sm:$0xff]  ;;  %vm622_vm2 = vcmask 261120   ;;  %v2104_v17 = vmov 32.0   ;;  %v2105_v30 = vmov -1e+09  }
  0x48   : > { %1632 = vmatmul.msk.f32.vlgmr.msra.gmra.mxu0 %vm588_vm1, %v583_v1  ;;  %v617_v5 = vld [vmem:[%s2608_s4] sm:$0xff]  ;;  %1851 = vrcp.f32 %v2104_v17  ;;  %vm684_vm5 = vcmask 57344  }
  0x49   : > { %639 = vmatpush.msra.mxu1 %v619_v3  ;;  %v585_v6 = vld [vmem:[%s2609_s5] sm:$0xf] }
  0x4a   : > { %v587_v7 = vperm.slane %v585_v6, 0  ;;  %v621_v11 = vperm.slane %v585_v6, 1  ;;  %v584_v13 = vld [vmem:[%s2316_s12] sm:$0xff]  ;;  %v676_v41 = vperm.slane %v585_v6, 2  ;;  %v678_v43 = vperm.slane %v585_v6, 3 }
  0x4b   : > { %640 = vmatpush.msra.mxu1 %v618_v4  ;;  %v681_v29 = vld [vmem:[%s577_s28] sm:$0x1] }
  0x4c   : > { %vm682_vm4 = vcmp.gt.f32.partialorder %v681_v29, 0.0 }
  0x4d   : > { %641 = vmatpush.msra.mxu1 %v617_v5  ;;  %v683_v31 = vsel %vm682_vm4, 0.0, %v2105_v30 }
  0x4e   : > { %v1852_v18 = vpop.eup %1851  ;;  %685 = vst.msk [vmem:[#allocation3] sm:$0x1] %vm684_vm5, %v683_v31 }
  0x4f   : > { %v651_v19 = vmul.f32 32.0, %v1852_v18  ;;  %vm655_vm3 = vweird.f32 %v1852_v18 }
  0x51   : > { %v652_v20 = vsub.f32 1.0, %v651_v19 }
  0x53   : > { %v653_v21 = vmul.f32 %v1852_v18, %v652_v20 }
  0x55   : > { %v654_v22 = vadd.f32 %v1852_v18, %v653_v21 }
  0x57   : > { %v656_v23 = vsel %vm655_vm3, %v1852_v18, %v654_v22 }
  0xc5   : > { %v613_v8 = vpop.f32.mrf.mxu0 }
  0xc6   : > { %v614_v9 = vadd.f32 %v613_v8, %v587_v7 }
  0xc8   : > { %v616_v10 = vmax.f32 %v614_v9, 0.0 }
  0xca   : > { %1633 = vmatmul.msk.f32.vlgmr.msra.gmra.mxu1 %vm622_vm2, %v616_v10 }
 0x147   : > { %v643_v12 = vpop.f32.mrf.mxu1 }
 0x148   : > { %v644_v14 = vadd.f32 %v643_v12, %v621_v11 }
 0x14a   : > { %v646_v15 = vadd.f32 %v644_v14, %v584_v13 }
 0x14c   : > { %v647_v16 = vsel %vm622_vm2, %v646_v15, 0.0 }
 0x14d   : > { %648 = vadd.xlane.f32.xlu0 %v647_v16 }
 0x1c0   : > { %v649_v24 = vpop.xlane.xlu0 %648 }
 0x1c1   : > { %v657_v25 = vmul.f32 %v656_v23, %v649_v24 }
 0x1c3   : > { %v658_v26 = vsub.f32 %v646_v15, %v657_v25 }
 0x1c5   : > { %v659_v27 = vmul.f32 %v658_v26, %v658_v26 }
 0x1c7   : > { %v660_v28 = vsel %vm622_vm2, %v659_v27, 0.0 }
 0x1c8   : > { %661 = vadd.xlane.f32.xlu0 %v660_v28 }
 0x23b   : > { %v662_v32 = vpop.xlane.xlu0 %661 }
 0x23c   : > { %v663_v33 = vmul.f32 %v662_v32, %v656_v23 }
 0x23e   : > { %v664_v34 = vadd.f32 1e-06, %v663_v33 }
 0x240   : > { %1853 = vrsqrt.f32 %v664_v34  ;;  %vm671_vm7 = vweird.f32 %v664_v34 }
 0x246   : > { %v1854_v35 = vpop.eup %1853 }
 0x247   : > { %v666_v36 = vmul.f32 %v1854_v35, %v664_v34  ;;  %vm672_vm6 = vweird.f32 %v1854_v35 }
 0x248   : > { %vm673_vm8 = vmor %vm671_vm7, %vm672_vm6 }
 0x249   : > { %v667_v37 = vmul.f32 %v1854_v35, %v666_v36 }
 0x24b   : > { %v668_v38 = vmul.f32 0.5, %v667_v37 }
 0x24d   : > { %v669_v39 = vsub.f32 1.5, %v668_v38 }
 0x24f   : > { %v670_v40 = vmul.f32 %v1854_v35, %v669_v39 }
 0x251   : > { %v674_v42 = vsel %vm673_vm8, %v1854_v35, %v670_v40 }
 0x252   : > { %v675_v44 = vmul.f32 %v674_v42, %v658_v26 }
 0x254   : > { %v677_v45 = vmul.f32 %v676_v41, %v675_v44 }
 0x256   : > { %v679_v46 = vadd.f32 %v678_v43, %v677_v45 }
 0x258   : > { %680 = vst.msk [vmem:[#allocation2] sm:$0xff] %vm622_vm2, %v679_v46 }
 0x259 PF: > { %s2374_s7 = sshll.u32 %s2081_s16, 4  ;;  %s2649_s23 = sld [smem:[#allocation22_spill]]  ;;  %vm730_vm9 = vcmask 261120   ;;  %v2107_v61 = vmov 1983009808   ;;  %vm815_vm10 = vcmask 1047556  }
 0x25a   : > { %s2650_s26 = sld [smem:[#allocation21_spill]]  ;;  %s2106_s8 = smov 112   ;;  %v811_v62 = vunpack.c.l.s4 %v2107_v61  ;;  %v2108_v63 = vmov 1934713408   ;;  %vm1066_vm11 = vcmask 130048   ;;  %vm1105_vm12 = vcmask 64512  }
 0x25b   : > { %s706_s21 = scalar_lea.vmem [#allocation7], %s2374_s7  ;;  %v818_v0 = vunpack.c.l.s4 %v2108_v63  ;;  %vm1133_vm13 = vcmask 1043456   ;;  %s712_s22 = scalar_lea.vmem [#allocation9], %s2374_s7  ;;  %vm1402_vm2 = vcmask 523264  }
 0x25c   : > { %v1721_v59 = vld [vmem:[%s706_s21 + $0x8] sm:$0xff]  ;;  %v1720_v60 = vld [vmem:[%s706_s21] sm:$0xff]  ;;  %v2394_v1 = vunpack.c.0.s8 %v811_v62  ;;  %s2109_s12 = smov 16   ;;  %s2651_s6 = sld [smem:[#allocation28_spill]] }
 0x25d   : > { %792 = vmatpush.bf16.msra.mxu2 %v1721_v59  ;;  %v2396_v4 = vunpack.c.0.s8 %v818_v0  ;;  %s1728_s10 = sshll.u32 %s2081_s16, 5  ;;  %p1708_p8 = scmp.ne.s32.totalorder %s2081_s16, 1 }
 0x25f   : > { %s700_s29 = scalar_lea.vmem %s2649_s23, %s2374_s7  ;;  %v2384_v50 = vld [vmem:[#allocation2] sm:$0xff] }
 0x260   : > { %s694_s9 = scalar_lea.vmem %s2650_s26, %s2374_s7  ;;  %v1718_v47 = vld [vmem:[%s700_s29 + $0x8] sm:$0xff]  ;;  %v1717_v49 = vld [vmem:[%s700_s29] sm:$0xff]  ;;  %v717_v52 = vpack.c.bf16 %v2384_v50, %v2384_v50  ;;  %s1329_s29 = scalar_lea.vmem [#allocation10], %s2374_s7 }
 0x261   : > { %v1715_v48 = vld [vmem:[%s694_s9 + $0x8] sm:$0xff]  ;;  %766 = vmatpush.bf16.msra.mxu1 %v1718_v47  ;;  %v1714_v51 = vld [vmem:[%s694_s9] sm:$0xff]  ;;  %793 = vmatpush.bf16.msra.mxu2 %v1720_v60  ;;  %s2652_s9 = sld [smem:[#allocation26_spill]]  ;;  %s1634_s7 = sshll.u32 %s2081_s16, 3 }
 0x262   : > { %740 = vmatpush.bf16.msra.mxu0 %v1715_v48  ;;  %s690_s23 = scalar_lea.vmem %s2651_s6, %s2081_s16 }
 0x264   : > { %1666 = vmatmul.msk.bf16.vlgmr.msra.gmra.mxu2 %vm730_vm9, %v717_v52 }
 0x265   : > { %767 = vmatpush.bf16.msra.mxu1 %v1717_v49 }
 0x266   : > { %741 = vmatpush.bf16.msra.mxu0 %v1714_v51 }
 0x268   : > { %1657 = vmatmul.msk.bf16.vlgmr.msra.gmra.mxu1 %vm730_vm9, %v717_v52 }
 0x269   : > { %1648 = vmatmul.msk.bf16.vlgmr.msra.gmra.mxu0 %vm730_vm9, %v717_v52 }
 0x2e5   : > { %v769_v53 = vpop.f32.mrf.mxu1 }
 0x2e6   : > { %v743_v54 = vpop.f32.mrf.mxu0  ;;  %v773_v55 = vpack.c.bf16 %v769_v53, %v769_v53 }
 0x2e7   : > { %v747_v56 = vpack.c.bf16 %v743_v54, %v743_v54 }
 0x2e8   : > { %889 = vrot.lane.b32.xlu0 %v773_v55, %s2106_s8  ;;  %v894_v3 = vshrl.u32 %v773_v55, 16 }
 0x2e9   : > { %v806_v20 = vshrl.u32 %v747_v56, 16 }
 0x2ed   : > { %v771_v57 = vpop.f32.mrf.mxu1 }
 0x2ee   : > { %v745_v58 = vpop.f32.mrf.mxu0 }
 0x2f0   : > { %801 = vrot.lane.b32.xlu0 %v747_v56, %s2106_s8 }
 0x35a   : > { %v890_v2 = vpop.permute.xlu0 %889 }
 0x35b   : > { %v893_v5 = vpack.i.b16 %v890_v2, %v773_v55  ;;  %v895_v6 = vshrl.u32 %v890_v2, 16 }
 0x35d   : > { %v896_v7 = vpack.i.b16 %v895_v6, %v894_v3  ;;  %v901_v8 = vperm.slane %v893_v5, %v2394_v1 }
 0x35f   : > { %v902_v9 = vrot.slane %v901_v8, 4  ;;  %v907_v10 = vperm.slane %v901_v8, %v2396_v4  ;;  %v920_v11 = vperm.slane %v896_v7, %v2394_v1 }
 0x361   : > { %v903_v12 = vsel %vm815_vm10, 0, %v902_v9  ;;  %v921_v13 = vrot.slane %v920_v11, 4  ;;  %v926_v15 = vperm.slane %v920_v11, %v2396_v4  ;;  %v912_v17 = vrot.slane %v907_v10, 4 }
 0x362   : > { %v911_v14 = vperm.slane %v903_v12, %v2396_v4  ;;  %v802_v16 = vpop.permute.xlu0 %801 }
 0x363   : > { %v922_v18 = vsel %vm815_vm10, 0, %v921_v13  ;;  %v805_v19 = vpack.i.b16 %v802_v16, %v747_v56  ;;  %v807_v23 = vshrl.u32 %v802_v16, 16  ;;  %v931_v26 = vrot.slane %v926_v15, 4 }
 0x364   : > { %v914_v21 = vrot.slane %v911_v14, 4  ;;  %v930_v22 = vperm.slane %v922_v18, %v2396_v4  ;;  %v913_v29 = vsel %vm815_vm10, 0, %v912_v17 }
 0x365   : > { %v813_v24 = vperm.slane %v805_v19, %v2394_v1  ;;  %v808_v28 = vpack.i.b16 %v807_v23, %v806_v20  ;;  %v932_v39 = vsel %vm815_vm10, 0, %v931_v26 }
 0x366   : > { %v915_v25 = vsel %vm815_vm10, 0, %v914_v21  ;;  %v933_v27 = vrot.slane %v930_v22, 4  ;;  %v935_v35 = vsel %vm815_vm10, %v914_v21, %v907_v10 }
 0x367   : > { %v940_v30 = vrot.slane %v915_v25, 4  ;;  %v814_v31 = vrot.slane %v813_v24, 4  ;;  %v820_v33 = vperm.slane %v813_v24, %v2396_v4  ;;  %v833_v34 = vperm.slane %v808_v28, %v2394_v1 }
 0x368   : > { %v934_v32 = vsel %vm815_vm10, 0, %v933_v27  ;;  %v939_v44 = vperm.slane %v935_v35, %v2394_v1  ;;  %v952_v52 = vsel %vm815_vm10, %v933_v27, %v926_v15 }
 0x369   : > { %v957_v36 = vrot.slane %v934_v32, 4  ;;  %v816_v37 = vsel %vm815_vm10, 0, %v814_v31  ;;  %v941_v38 = vsel %vm815_vm10, %v940_v30, %v913_v29  ;;  %v834_v41 = vrot.slane %v833_v34, 4  ;;  %v795_v30 = vpop.f32.mrf.mxu2 }
 0x36a   : > { %v824_v40 = vperm.slane %v816_v37, %v2396_v4  ;;  %v945_v42 = vperm.slane %v941_v38, %v2394_v1  ;;  %v839_v43 = vperm.slane %v833_v34, %v2396_v4  ;;  %v825_v46 = vrot.slane %v820_v33, 4 }
 0x36b   : > { %v958_v45 = vsel %vm815_vm10, %v957_v36, %v932_v39  ;;  %v835_v48 = vsel %vm815_vm10, 0, %v834_v41  ;;  %v956_v60 = vperm.slane %v952_v52, %v2394_v1  ;;  %v799_v31 = vpack.c.bf16 %v795_v30, %v795_v30 }
 0x36c   : > { %v827_v47 = vrot.slane %v824_v40, 4  ;;  %v946_v49 = vrot.slane %v945_v42, 4  ;;  %v843_v51 = vperm.slane %v835_v48, %v2396_v4  ;;  %v962_v53 = vperm.slane %v958_v45, %v2394_v1 }
 0x36d   : > { %v844_v56 = vrot.slane %v839_v43, 4  ;;  %v826_v59 = vsel %vm815_vm10, 0, %v825_v46  ;;  %976 = vrot.lane.b32.xlu2 %v799_v31, %s2106_s8  ;;  %v981_v42 = vshrl.u32 %v799_v31, 16  ;;  %s2535_s8 = scalar_lea.vmem %s2652_s9, %s1728_s10 }
 0x36e   : > { %v828_v54 = vsel %vm815_vm10, 0, %v827_v47  ;;  %v947_v55 = vsel %vm815_vm10, %v946_v49, %v939_v44  ;;  %v846_v57 = vrot.slane %v843_v51, 4  ;;  %v963_v61 = vrot.slane %v962_v53, 4 }
 0x36f   : > { %v853_v58 = vrot.slane %v828_v54, 4  ;;  %v848_v63 = vsel %vm815_vm10, %v827_v47, %v820_v33  ;;  %v951_v2 = vperm.slane %v947_v55, %v2396_v4  ;;  %v845_v7 = vsel %vm815_vm10, 0, %v844_v56  ;;  %v1855_v33 = vld [vmem:[#allocation3] ss:$0 sm:$0xff] }
 0x370   : > { %v847_v62 = vsel %vm815_vm10, 0, %v846_v57  ;;  %v964_v5 = vsel %vm815_vm10, %v963_v61, %v956_v60  ;;  %v852_v9 = vperm.slane %v848_v63, %v2394_v1  ;;  %v865_v10 = vsel %vm815_vm10, %v846_v57, %v839_v43 }
 0x371   : > { %v854_v0 = vsel %vm815_vm10, %v853_v58, %v826_v59  ;;  %v870_v3 = vrot.slane %v847_v62, 4  ;;  %v968_v8 = vperm.slane %v964_v5, %v2396_v4  ;;  %v972_v14 = vshrl.u32 %v951_v2, 16  ;;  %v797_v32 = vpop.f32.mrf.mxu2 }
 0x372   : > { %v858_v6 = vperm.slane %v854_v0, %v2394_v1  ;;  %v869_v20 = vperm.slane %v865_v10, %v2394_v1 }
 0x373   : > { %v871_v12 = vsel %vm815_vm10, %v870_v3, %v845_v7  ;;  %v971_v13 = vpack.i.b16 %v968_v8, %v951_v2  ;;  %v973_v15 = vshrl.u32 %v968_v8, 16 }
 0x374   : > { %v859_v11 = vrot.slane %v858_v6, 4  ;;  %v875_v16 = vperm.slane %v871_v12, %v2394_v1 }
 0x375   : > { %v1071_v18 = vsel %vm1066_vm11, %v971_v13, 0  ;;  %v974_v19 = vpack.i.b16 %v973_v15, %v972_v14 }
 0x376   : > { %v860_v17 = vsel %vm815_vm10, %v859_v11, %v852_v9  ;;  %v876_v21 = vrot.slane %v875_v16, 4  ;;  %1080 = vmatpush.bf16.xpose.msra.mxu3 %v1071_v18 }
 0x377   : > { %v864_v22 = vperm.slane %v860_v17, %v2396_v4  ;;  %v1090_v23 = vsel %vm1066_vm11, %v974_v19, 0 }
 0x378   : > { %v877_v24 = vsel %vm815_vm10, %v876_v21, %v869_v20  ;;  %1099 = vmatpush.bf16.xpose.msrb.mxu0 %v1090_v23 }
 0x379   : > { %v881_v25 = vperm.slane %v877_v24, %v2396_v4  ;;  %v885_v27 = vshrl.u32 %v864_v22, 16 }
 0x37b   : > { %v884_v26 = vpack.i.b16 %v881_v25, %v864_v22  ;;  %v886_v28 = vshrl.u32 %v881_v25, 16 }
 0x37d   : > { %v887_v29 = vpack.i.b16 %v886_v28, %v885_v27  ;;  %1667 = vmatmul.msk.bf16.vlgmr.msra.gmra.mxu3 %vm1066_vm11, %v884_v26 }
 0x37f   : > { %1668 = vmatmul.msk.bf16.vlgmr.msrb.gmra.mxu0 %vm1066_vm11, %v887_v29 }
 0x3c7   : > { %v977_v43 = vpop.permute.xlu2 %976 }
 0x3c8   : > { %v980_v44 = vpack.i.b16 %v977_v43, %v799_v31  ;;  %v982_v45 = vshrl.u32 %v977_v43, 16 }
 0x3ca   : > { %v983_v46 = vpack.i.b16 %v982_v45, %v981_v42  ;;  %v988_v47 = vperm.slane %v980_v44, %v2394_v1  ;;  %v1724_v44 = vld [vmem:[%s712_s22 + $0x8] sm:$0xff] }
 0x3cb   : > { %1287 = vmatpush.bf16.msrb.mxu3 %v1724_v44 }
 0x3cc   : > { %v989_v48 = vrot.slane %v988_v47, 4  ;;  %v994_v49 = vperm.slane %v988_v47, %v2396_v4  ;;  %v1007_v51 = vperm.slane %v983_v46, %v2394_v1 }
 0x3ce   : > { %v990_v52 = vsel %vm815_vm10, 0, %v989_v48  ;;  %v1008_v53 = vrot.slane %v1007_v51, 4  ;;  %v1013_v54 = vperm.slane %v1007_v51, %v2396_v4  ;;  %v999_v56 = vrot.slane %v994_v49, 4 }
 0x3cf   : > { %v998_v55 = vperm.slane %v990_v52, %v2396_v4 }
 0x3d0   : > { %v1009_v57 = vsel %vm815_vm10, 0, %v1008_v53  ;;  %v1018_v60 = vrot.slane %v1013_v54, 4  ;;  %v1000_v61 = vsel %vm815_vm10, 0, %v999_v56 }
 0x3d1   : > { %v1001_v58 = vrot.slane %v998_v55, 4  ;;  %v1017_v59 = vperm.slane %v1009_v57, %v2396_v4 }
 0x3d2   : > { %v1019_v3 = vsel %vm815_vm10, 0, %v1018_v60 }
 0x3d3   : > { %v1002_v62 = vsel %vm815_vm10, 0, %v1001_v58  ;;  %v1020_v63 = vrot.slane %v1017_v59, 4  ;;  %v1022_v0 = vsel %vm815_vm10, %v1001_v58, %v994_v49 }
 0x3d4   : > { %v1027_v2 = vrot.slane %v1002_v62, 4  ;;  %v1026_v9 = vperm.slane %v1022_v0, %v2394_v1 }
 0x3d5   : > { %v1021_v5 = vsel %vm815_vm10, 0, %v1020_v63  ;;  %v1039_v8 = vsel %vm815_vm10, %v1020_v63, %v1013_v54 }
 0x3d6   : > { %v1044_v6 = vrot.slane %v1021_v5, 4  ;;  %v1028_v7 = vsel %vm815_vm10, %v1027_v2, %v1000_v61  ;;  %v1043_v13 = vperm.slane %v1039_v8, %v2394_v1 }
 0x3d7   : > { %v1032_v10 = vperm.slane %v1028_v7, %v2394_v1 }
 0x3d8   : > { %v1045_v11 = vsel %vm815_vm10, %v1044_v6, %v1019_v3 }
 0x3d9   : > { %v1033_v12 = vrot.slane %v1032_v10, 4  ;;  %v1049_v14 = vperm.slane %v1045_v11, %v2394_v1 }
 0x3db   : > { %v1034_v15 = vsel %vm815_vm10, %v1033_v12, %v1026_v9  ;;  %v1050_v16 = vrot.slane %v1049_v14, 4 }
 0x3dc   : > { %v1038_v17 = vperm.slane %v1034_v15, %v2396_v4 }
 0x3dd   : > { %v1051_v18 = vsel %vm815_vm10, %v1050_v16, %v1043_v13 }
 0x3de   : > { %v1055_v19 = vperm.slane %v1051_v18, %v2396_v4  ;;  %v1059_v21 = vshrl.u32 %v1038_v17, 16 }
 0x3e0   : > { %v1058_v20 = vpack.i.b16 %v1055_v19, %v1038_v17  ;;  %v1060_v22 = vshrl.u32 %v1055_v19, 16 }
 0x3e2   : > { %v1135_v23 = vsel %vm1133_vm13, %v1058_v20, 0  ;;  %v1061_v24 = vpack.i.b16 %v1060_v22, %v1059_v21 }
 0x3e3   : > { %1144 = vmatpush.bf16.msrb.mxu1 %v1135_v23 }
 0x3e4   : > { %v1154_v25 = vsel %vm1133_vm13, %v1061_v24, 0 }
 0x3e5   : > { %1163 = vmatpush.bf16.msrb.mxu2 %v1154_v25 }
 0x3fc   : > { %v1101_v34 = vpop.f32.mrf.mxu0 }
 0x3fd   : > { %v1102_v35 = vadd.f32 %v1855_v33, %v1101_v34 }
 0x3ff   : > { %v1109_v36 = vsel %vm1105_vm12, %v1102_v35, -inf }
 0x400   : > { %v1082_v37 = vpop.f32.mrf.mxu3  ;;  %1110 = vmax.xlane.f32.xlu1 %v1109_v36 }
 0x401   : > { %v1083_v38 = vadd.f32 %v1855_v33, %v1082_v37 }
 0x403   : > { %v1106_v40 = vsel %vm1105_vm12, %v1083_v38, -inf }
 0x404   : > { %v1103_v39 = vpop.f32.mrf.mxu0 }
 0x408   : > { %v1084_v41 = vpop.f32.mrf.mxu3  ;;  %1107 = vmax.xlane.f32.xlu1 %v1106_v40 }
 0x473   : > { %v1111_v26 = vpop.xlane.xlu1 %1110 }
 0x474   : > { %v1113_v27 = vsub.f32 %v1102_v35, %v1111_v26 }
 0x476   : > { %v1116_v28 = vmul.f32 1.442695, %v1113_v27 }
 0x478   : > { %1857 = vpow2.f32 %v1116_v28 }
 0x47b   : > { %v1108_v29 = vpop.xlane.xlu1 %1107 }
 0x47c   : > { %v1112_v30 = vsub.f32 %v1083_v38, %v1108_v29 }
 0x47e   : > { %v1858_v31 = vpop.eup %1857  ;;  %v1114_v32 = vmul.f32 1.442695, %v1112_v30 }
 0x47f   : > { %v1121_v33 = vsel %vm1105_vm12, %v1858_v31, 0.0 }
 0x480   : > { %1859 = vpow2.f32 %v1114_v32  ;;  %1122 = vadd.xlane.f32.xlu2 %v1121_v33 }
 0x486   : > { %v1860_v34 = vpop.eup %1859 }
 0x487   : > { %v1118_v36 = vsel %vm1105_vm12, %v1860_v34, 0.0 }
 0x488   : > { %1119 = vadd.xlane.f32.xlu0 %v1118_v36 }
 0x4f3   : > { %v1123_v37 = vpop.xlane.xlu2 %1122 }
 0x4f4   : > { %1861 = vrcp.f32 %v1123_v37  ;;  %v1723_v37 = vld [vmem:[%s712_s22] sm:$0xff] }
 0x4f5   : > { %1288 = vmatpush.bf16.msrb.mxu3 %v1723_v37 }
 0x4fa   : > { %v1862_v39 = vpop.eup %1861 }
 0x4fb   : > { %v1127_v35 = vmul.f32 %v1862_v39, %v1858_v31  ;;  %v1120_v40 = vpop.xlane.xlu0 %1119 }
 0x4fc   : > { %1863 = vrcp.f32 %v1120_v40 }
 0x4fd   : > { %v1129_v41 = vpack.c.bf16 %v1127_v35, %v1127_v35 }
 0x4ff   : > { %1670 = vmatmul.msk.bf16.vlgmr.msrb.gmra.mxu2 %vm1105_vm12, %v1129_v41 }
 0x502   : > { %v1864_v38 = vpop.eup %1863 }
 0x503   : > { %v1126_v42 = vmul.f32 %v1864_v38, %v1860_v34 }
 0x505   : > { %v1128_v43 = vpack.c.bf16 %v1126_v42, %v1126_v42  ;;  %v2110_v42 = vmov 32.0  }
 0x506   : > { %1865 = vrcp.f32 %v2110_v42 }
 0x507   : > { %1669 = vmatmul.msk.bf16.vlgmr.msrb.gmra.mxu1 %vm1105_vm12, %v1128_v43 }
 0x50c   : > { %v1866_v43 = vpop.eup %1865 }
 0x50d   : > { %v1298_v44 = vmul.f32 32.0, %v1866_v43  ;;  %vm1302_vm14 = vweird.f32 %v1866_v43 }
 0x582   : > { %v1165_v45 = vpop.f32.mrf.mxu2 }
 0x583   : > { %v1180_v46 = vrot.slane %v1165_v45, 4  ;;  %v1185_v47 = vperm.slane %v1165_v45, %v2394_v1  ;;  %v1299_v45 = vsub.f32 1.0, %v1298_v44 }
 0x584   : > { %v1146_v48 = vpop.f32.mrf.mxu1 }
 0x585   : > { %v1181_v49 = vsel %vm815_vm10, 0.0, %v1180_v46  ;;  %v1190_v51 = vrot.slane %v1185_v47, 4  ;;  %v1169_v52 = vrot.slane %v1146_v48, 4  ;;  %v1175_v53 = vperm.slane %v1146_v48, %v2394_v1 }
 0x586   : > { %v1189_v54 = vperm.slane %v1181_v49, %v2394_v1  ;;  %v1300_v46 = vmul.f32 %v1866_v43, %v1299_v45 }
 0x587   : > { %v1171_v55 = vsel %vm815_vm10, 0.0, %v1169_v52  ;;  %v1191_v56 = vsel %vm815_vm10, %v1190_v51, %v1175_v53  ;;  %v1192_v57 = vrot.slane %v1175_v53, 4 }
 0x588   : > { %v1202_v58 = vrot.slane %v1189_v54, 4  ;;  %v1179_v59 = vperm.slane %v1171_v55, %v2394_v1  ;;  %v1197_v60 = vperm.slane %v1191_v56, %v2396_v4  ;;  %v1726_v55 = vld [vmem:[%s1329_s29] sm:$0xff]  ;;  %v1732_v56 = vld [vmem:[%s2535_s8 + $0x18] sm:$0xff] }
 0x589   : > { %v1193_v61 = vsel %vm815_vm10, %v1185_v47, %v1192_v57  ;;  %v1301_v47 = vadd.f32 %v1866_v43, %v1300_v46  ;;  %1410 = vmatpush.bf16.msra.mxu1 %v1732_v56 }
 0x58a   : > { %v1201_v62 = vperm.slane %v1193_v61, %v2396_v4  ;;  %v1203_v63 = vsel %vm815_vm10, %v1202_v58, %v1179_v59  ;;  %v1204_v0 = vrot.slane %v1179_v59, 4  ;;  %v1167_v2 = vpop.f32.mrf.mxu2  ;;  %v1214_v6 = vrot.slane %v1197_v60, 4  ;;  %v1731_v59 = vld [vmem:[%s2535_s8 + $0x10] sm:$0xff] }
 0x58b   : > { %v1209_v3 = vperm.slane %v1203_v63, %v2396_v4  ;;  %v2522_v48 = vsel %vm1302_vm14, %v1866_v43, %v1301_v47 }
 0x58c   : > { %v1205_v5 = vsel %vm815_vm10, %v1189_v54, %v1204_v0  ;;  %v1216_v7 = vrot.slane %v1201_v62, 4  ;;  %v1148_v8 = vpop.f32.mrf.mxu1  ;;  %v1215_v14 = vsel %vm815_vm10, 0.0, %v1214_v6  ;;  %v1727_v54 = vld [vmem:[%s1329_s29 + $0x8] sm:$0xff] }
 0x58d   : > { %v1213_v9 = vperm.slane %v1205_v5, %v2396_v4  ;;  %v1218_v11 = vrot.slane %v1209_v3, 4  ;;  %1358 = vmatpush.bf16.msra.mxu0 %v1727_v54  ;;  %1411 = vmatpush.bf16.msra.mxu1 %v1731_v59 }
 0x58e   : > { %v1217_v10 = vsel %vm815_vm10, 0.0, %v1216_v7  ;;  %v1222_v16 = vsel %vm815_vm10, %v1216_v7, %v1197_v60 }
 0x58f   : > { %v1220_v12 = vrot.slane %v1213_v9, 4  ;;  %v1227_v13 = vrot.slane %v1217_v10, 4  ;;  %v1219_v20 = vsel %vm815_vm10, 0.0, %v1218_v11  ;;  %v1226_v21 = vperm.slane %v1222_v16, %v2394_v1 }
 0x591   : > { %v1221_v15 = vsel %vm815_vm10, 0.0, %v1220_v12  ;;  %v1228_v17 = vsel %vm815_vm10, %v1227_v13, %v1215_v14  ;;  %v1233_v22 = vsel %vm815_vm10, %v1220_v12, %v1209_v3  ;;  %1359 = vmatpush.bf16.msra.mxu0 %v1726_v55  ;;  %v1730_v13 = vld [vmem:[%s2535_s8 + $0x8] sm:$0xff]  ;;  %v1729_v14 = vld [vmem:[%s2535_s8] sm:$0xff] }
 0x592   : > { %v1238_v18 = vrot.slane %v1221_v15, 4  ;;  %v1232_v19 = vperm.slane %v1228_v17, %v2394_v1  ;;  %v1237_v27 = vperm.slane %v1233_v22, %v2394_v1  ;;  %1412 = vmatpush.bf16.msra.mxu1 %v1730_v13  ;;  %v1856_v15 = vld [vmem:[%s690_s23] ss:$0 sm:$0xff] }
 0x594   : > { %v1239_v23 = vsel %vm815_vm10, %v1238_v18, %v1219_v20  ;;  %v1244_v24 = vrot.slane %v1232_v19, 4 }
 0x595   : > { %v1243_v25 = vperm.slane %v1239_v23, %v2394_v1 }
 0x596   : > { %v1245_v26 = vsel %vm815_vm10, %v1244_v24, %v1226_v21  ;;  %1413 = vmatpush.bf16.msra.mxu1 %v1729_v14 }
 0x597   : > { %v1249_v28 = vperm.slane %v1245_v26, %v2396_v4  ;;  %v1250_v29 = vrot.slane %v1243_v25, 4 }
 0x599   : > { %v1251_v30 = vsel %vm815_vm10, %v1250_v29, %v1237_v27  ;;  %v1258_v31 = vrot.slane %v1249_v28, 4 }
 0x59a   : > { %v1255_v32 = vperm.slane %v1251_v30, %v2396_v4 }
 0x59c   : > { %v1259_v33 = vsel %vm815_vm10, %v1255_v32, %v1258_v31  ;;  %v1256_v34 = vrot.slane %v1255_v32, 4 }
 0x59d   : > { %1261 = vrot.lane.b32.xlu1 %v1259_v33, %s2109_s12  ;;  %s2653_s12 = sld [smem:[#allocation27_spill]] }
 0x59e   : > { %v1257_v36 = vsel %vm815_vm10, %v1256_v34, %v1249_v28 }
 0x5a3   : > { %s688_s25 = scalar_lea.vmem %s2653_s12, %s1634_s7 }
 0x5a4   : > { %v689_v2 = vld [vmem:[%s688_s25] sm:$0x1f] }
 0x5a5   : > { %v1323_v6 = vperm.slane %v689_v2, 0  ;;  %v1325_v8 = vperm.slane %v689_v2, 1  ;;  %v1377_v21 = vperm.slane %v689_v2, 2 }
 0x60f   : > { %v1262_v39 = vpop.permute.xlu1 %1261 }
 0x610   : > { %v1264_v1 = vsel %vm1066_vm11, %v1257_v36, %v1262_v39 }
 0x611   : > { %v1265_v35 = vpack.c.bf16 %v1264_v1, %v1264_v1 }
 0x613   : > { %1679 = vmatmul.msk.bf16.vlgmr.msrb.gmra.mxu3 %vm730_vm9, %v1265_v35 }
 0x696   : > { %v1290_v40 = vpop.f32.mrf.mxu3 }
 0x697   : > { %v1291_v41 = vadd.f32 %v1290_v40, %v2384_v50 }
 0x699   : > { %v1294_v4 = vsel %vm730_vm9, %v1291_v41, 0.0 }
 0x69a   : > { %1295 = vadd.xlane.f32.xlu1 %v1294_v4 }
 0x69e   : > { %v1292_v38 = vpop.f32.mrf.mxu3 }
 0x69f   : > { %v1444_v38 = vperm.slane %v689_v2, 4 }
 0x70d   : > { %v1296_v49 = vpop.xlane.xlu1 %1295 }
 0x70e   : > { %v1304_v50 = vmul.f32 %v2522_v48, %v1296_v49 }
 0x710   : > { %v1305_v51 = vsub.f32 %v1291_v41, %v1304_v50  ;;  %v1442_v41 = vperm.slane %v689_v2, 3 }
 0x712   : > { %v1306_v52 = vmul.f32 %v1305_v51, %v1305_v51 }
 0x714   : > { %v1307_v53 = vsel %vm730_vm9, %v1306_v52, 0.0 }
 0x715   : > { %1308 = vadd.xlane.f32.xlu2 %v1307_v53 }
 0x788   : > { %v1309_v57 = vpop.xlane.xlu2 %1308 }
 0x789   : > { %v1310_v58 = vmul.f32 %v1309_v57, %v2522_v48 }
 0x78b   : > { %v1311_v60 = vadd.f32 1e-06, %v1310_v58 }
 0x78d   : > { %1867 = vrsqrt.f32 %v1311_v60  ;;  %vm1318_vm0 = vweird.f32 %v1311_v60 }
 0x793   : > { %v1868_v61 = vpop.eup %1867 }
 0x794   : > { %v1313_v62 = vmul.f32 %v1868_v61, %v1311_v60  ;;  %vm1319_vm15 = vweird.f32 %v1868_v61 }
 0x795   : > { %vm1320_vm1 = vmor %vm1318_vm0, %vm1319_vm15 }
 0x796   : > { %v1314_v63 = vmul.f32 %v1868_v61, %v1313_v62 }
 0x798   : > { %v1315_v0 = vmul.f32 0.5, %v1314_v63 }
 0x79a   : > { %v1316_v3 = vsub.f32 1.5, %v1315_v0 }
 0x79c   : > { %v1317_v5 = vmul.f32 %v1868_v61, %v1316_v3 }
 0x79e   : > { %v1321_v7 = vsel %vm1320_vm1, %v1868_v61, %v1317_v5 }
 0x79f   : > { %v1322_v9 = vmul.f32 %v1321_v7, %v1305_v51 }
 0x7a1   : > { %v1324_v10 = vmul.f32 %v1323_v6, %v1322_v9 }
 0x7a3   : > { %v1326_v11 = vadd.f32 %v1325_v8, %v1324_v10 }
 0x7a5   : > { %v1327_v12 = vpack.c.bf16 %v1326_v11, %v1326_v11 }
 0x7a7   : > { %1689 = vmatmul.msk.bf16.vlgmr.msra.gmra.mxu0 %vm730_vm9, %v1327_v12 }
 0x824   : > { %v1361_v16 = vpop.f32.mrf.mxu0 }
 0x825   : > { %v1362_v17 = vadd.f32 %v1856_v15, %v1361_v16 }
 0x827   : > { %v1365_v18 = vmax.f32 %v1362_v17, 0.0 }
 0x829   : > { %v1366_v19 = vpack.c.bf16 %v1365_v18, %v1365_v18 }
 0x82b   : > { %1707 = vmatmul.msk.bf16.vlgmr.msra.gmra.mxu1 %vm1402_vm2, %v1366_v19 }
 0x82c   : > { %v1363_v20 = vpop.f32.mrf.mxu0 }
 0x8a8   : > { %v1415_v22 = vpop.f32.mrf.mxu1 }
 0x8a9   : > { %v1416_v23 = vadd.f32 %v1415_v22, %v1377_v21 }
 0x8ab   : > { %v1419_v24 = vadd.f32 %v1416_v23, %v1326_v11 }
 0x8ad   : > { %v1420_v25 = vsel %vm730_vm9, %v1419_v24, 0.0 }
 0x8ae   : > { %1421 = vadd.xlane.f32.xlu2 %v1420_v25 }
 0x8b0   : > { %v1417_v26 = vpop.f32.mrf.mxu1 }
 0x921   : > { %v1422_v27 = vpop.xlane.xlu2 %1421 }
 0x922   : > { %v1423_v28 = vmul.f32 %v1422_v27, %v2522_v48 }
 0x924   : > { %v1424_v29 = vsub.f32 %v1419_v24, %v1423_v28 }
 0x926   : > { %v1425_v30 = vmul.f32 %v1424_v29, %v1424_v29 }
 0x928   : > { %v1426_v31 = vsel %vm730_vm9, %v1425_v30, 0.0 }
 0x929   : > { %1427 = vadd.xlane.f32.xlu0 %v1426_v31 }
 0x99c   : > { %v1428_v32 = vpop.xlane.xlu0 %1427 }
 0x99d   : > { %v1429_v33 = vmul.f32 %v1428_v32, %v2522_v48 }
 0x99f   : > { %v1430_v34 = vadd.f32 1e-06, %v1429_v33 }
 0x9a1   : > { %1869 = vrsqrt.f32 %v1430_v34  ;;  %vm1437_vm4 = vweird.f32 %v1430_v34 }
 0x9a7   : > { %v1870_v36 = vpop.eup %1869 }
 0x9a8   : > { %v1432_v37 = vmul.f32 %v1870_v36, %v1430_v34  ;;  %vm1438_vm3 = vweird.f32 %v1870_v36 }
 0x9a9   : > { %vm1439_vm5 = vmor %vm1437_vm4, %vm1438_vm3 }
 0x9aa   : > { %v1433_v39 = vmul.f32 %v1870_v36, %v1432_v37 }
 0x9ac   : > { %v1434_v1 = vmul.f32 0.5, %v1433_v39 }
 0x9ae   : > { %v1435_v35 = vsub.f32 1.5, %v1434_v1 }
 0x9b0   : > { %v1436_v40 = vmul.f32 %v1870_v36, %v1435_v35 }
 0x9b2   : > { %v1440_v4 = vsel %vm1439_vm5, %v1870_v36, %v1436_v40 }
 0x9b3   : > { %v1441_v42 = vmul.f32 %v1440_v4, %v1424_v29 }
 0x9b5   : > { %v1443_v43 = vmul.f32 %v1442_v41, %v1441_v42  ;;  %1450 = sbr.rel (%p1708_p8) target bundleno = 2491 (0x9bb), region = 100 }
 0x9b7   : > { %v1445_v44 = vadd.f32 %v1444_v38, %v1443_v43 }
 0x9b9   : > { %1446 = vst.msk [vmem:[#allocation2] sm:$0xff] %vm730_vm9, %v1445_v44 }
 0x9ba   : > { %1451 = vst.msk [vmem:[%s2342_s24] sm:$0xff] %vm730_vm9, %v1445_v44 }
 0x9bb PF: > { %s1710_s23 = sshll.u32 %s2085_s17, 3  ;;  %s2654_s26 = sld [smem:[#allocation29_spill]] }
 0x9bc   : > { %s1465_s8 = sshll.u32 %s2342_s24, 4  ;;  %s1453_s21 = scalar_lea.sflag [#allocation6], %s2312_s13  ;;  %s1466_s8 = int_to_ptr.vmem [resolvable:$true] %s1465_s8 }
 0x9c1   : > { %s1463_s9 = scalar_lea.hbm %s2654_s26, %s1710_s23  ;;  %s2011_s17 = scalar_lea.hbm %s2654_s26, 16 }
 0x9c2   : > { %s1467_s7 = sshll.u32 %s1463_s9, 4  ;;  %s1468_s7 = int_to_ptr.hbm [resolvable:$true] %s1467_s7 }
 0x9c3   : > { %s2005_s16 = sshra.s32 %s1468_s7, 4  ;;  %s2006_s16 = int_to_ptr.hbm [resolvable:$true] %s2005_s16 }
 0x9c4   : > { %s2007_s22 = scalar_lea.hbm %s2006_s16, 8  ;;  %p2012_p12 = scmp.lt.s32.totalorder %s2006_s16, %s2654_s26 }
 0x9c5   : > { %p2008_p9 = scmp.ne.s32.totalorder %s2006_s16, %s2007_s22  ;;  %p2013_p13 = scmp.lt.s32.totalorder %s2011_s17, %s2007_s22 }
 0x9c7   : > { %p2009_p10 = pnand %p2008_p9, %p2288_p2  ;;  %p2014_p0 = por %p2013_p13, %p2012_p12 }
 0x9c9   : > { %p2010_p11 = pneg %p2009_p10 }
 0x9cb   : > { %p2015_p5 = pnand %p2014_p0, %p2010_p11 }
 0x9cd   : > { %2018 = shalt.err (!%p2015_p5)
}
 0x9ce   : > { %1747 = dma.vmem_to_hbm [thread:$0]  (%p2288_p2), %s1466_s8, 128, %s1468_s7, %s1453_s21  }
 0x9cf PF: > { %s2655_s13 = sld [smem:[#allocation17_spill]]  ;;  %p1774_p6 = scmp.ge.s32.totalorder %s2097_s20, 2 }
 0x9d1   : > { %p1764_p7 = pnand %p1774_p6, %p2292_p4 }
 0x9d3   : > { %p1765_p3 = pneg %p1764_p7 }
 0x9d5   : > { %s1479_s23 = sand.u32 1, %s2655_s13  }
 0x9d6   : > { %s1480_s10 = scalar_lea.sflag [#allocation6], %s1479_s23 }
 0x9d7   : > { %2064 = dma.done.wait (%p1765_p3), %s1480_s10, 128  }
 0x9d8   : > { %2066 = vsyncadd (%p1765_p3), %s1480_s10, 4294967168  ;;  %s32_s20 = sadd.s32 1, %s2097_s20   ;;  %s2657_s16 = sld [smem:[#allocation18_spill]] }
 0x9d9   : > { %p29_p1 = scmp.ge.s32.totalorder %s32_s20, 6   ;;  %s2658_s18 = sld [smem:[#allocation19_spill]] }
 0x9da   : > { %s2659_s29 = smov %s2073_s30  ;;  %s2660_s30 = smov %s2077_s15 }
 0x9db   : > { %s2661_s15 = smov %s2301_s14  ;;  %s2662_s17 = smov %s2093_s19 }
 0x9dc   : > { %s2663_s19 = smov %s2669_s27  ;;  %31 = sbr.rel (!%p29_p1) target bundleno = 19 (0x13), region = 155 }
 0x9e1   :  { %1486 = vsyncpa [#allocation5], 1 }
 0x9e2   :  { %1488 = vsyncpa [#allocation5 + $0x1], 1 }
 0x9e3   :  { %1489 = vsyncpa [#allocation8], 1 }
 0x9e4   :  { %1490 = vsyncpa [#allocation11], 1 }
 0x9e5   :  { %1491 = vsyncpa [#allocation6], 1 }
 0x9e6   :  { %1493 = vsyncpa [#allocation6 + $0x1], 1 }

</bundles_post_ra>
